<compile_context>
chip_gen: v7x
topology: tpu7x:2x2x1
jax: 0.10.0
libtpu: 0.0.40
codegen_flags: <defaults>
</compile_context>

<pallas_src>
import jax
import jax.numpy as jnp
import numpy as np
from jax.experimental import pallas as pl
from jax.experimental.pallas import tpu as pltpu

BATCH = 2
SEQ = 8
HIDDEN = 32
N_HEAD = 4
HEAD_DIM = HIDDEN // N_HEAD
FFN = 4 * HIDDEN
EPS = 1e-5
INV_NORM = 1.0 / (HEAD_DIM ** 0.5)
MASK_VALUE = float(jnp.finfo(jnp.float32).min)   # used by the reference (masked_fill)
MASK_BIAS = -1e30                                # additive mask bias used by the kernel
PACK_W = max(128, 3 * HIDDEN, FFN)               # lane width of the packed-vector array


def _layernorm(x, g, b):
    mu = jnp.mean(x, axis=-1, keepdims=True)
    var = jnp.mean((x - mu) ** 2, axis=-1, keepdims=True)
    return (x - mu) * jax.lax.rsqrt(var + EPS) * g + b


def _bloom_gelu(x):
    return x * 0.5 * (1.0 + jnp.tanh(0.79788456 * x * (1.0 + 0.044715 * x * x)))


def bloom_block_kernel(x_ref, bias_ref, wqkv_ref, wd_ref, w1_ref, w2_ref,
                       vecs_ref, out_ref):
    x = x_ref[...]                                    # [B*S, H] f32 (residual kept f32)
    vecs = vecs_ref[...]                              # [8, PACK_W] f32 packed vectors
    ln1_g = vecs[0:1, :HIDDEN]
    ln1_b = vecs[1:2, :HIDDEN]
    bqkv = vecs[2:3, :3 * HIDDEN]                     # permuted + Q-scaled
    bd = vecs[3:4, :HIDDEN]
    ln2_g = vecs[4:5, :HIDDEN]
    ln2_b = vecs[5:6, :HIDDEN]
    b1 = vecs[6:7, :FFN]
    b2 = vecs[7:8, :HIDDEN]

    # ---- input_layernorm + fused QKV (Q columns pre-scaled by 1/sqrt(d)) ----
    ln1 = _layernorm(x, ln1_g, ln1_b)
    qkv = jnp.dot(ln1.astype(jnp.bfloat16), wqkv_ref[...],
                  preferred_element_type=jnp.float32) + bqkv     # [B*S, 3H] f32
    qkv_b = qkv.astype(jnp.bfloat16)                  # single cast for all MXU operands

    wd = wd_ref[...]                                  # [H, H] bf16

    # ---- attention: head-outer / batch-inner; head-merge folded into Wd rows ----
    attn_dense = jnp.zeros((BATCH * SEQ, HIDDEN), jnp.float32)
    for h in range(N_HEAD):
        c0 = h * HEAD_DIM
        q_all = qkv_b[:, c0:c0 + HEAD_DIM]                               # [B*S, D]
        k_all = qkv_b[:, HIDDEN + c0:HIDDEN + c0 + HEAD_DIM]             # [B*S, D]
        v_all = qkv_b[:, 2 * HIDDEN + c0:2 * HIDDEN + c0 + HEAD_DIM]     # [B*S, D]
        ctx_parts = []
        for b in range(BATCH):
            r0 = b * SEQ
            q = q_all[r0:r0 + SEQ]
            k = k_all[r0:r0 + SEQ]
            v = v_all[r0:r0 + SEQ]
            # bias already holds alibi + (large negative) * causal_mask
            scores = bias_ref[b, h] + jax.lax.dot_general(
                q, k, (((1,), (1,)), ((), ())),
                preferred_element_type=jnp.float32)              # [S, S] f32
            m = jnp.max(scores, axis=-1, keepdims=True)
            p = jnp.exp(scores - m)
            p = p * pl.reciprocal(jnp.sum(p, axis=-1, keepdims=True), approx=True)
            ctx_parts.append(jnp.dot(p.astype(jnp.bfloat16), v,
                                     preferred_element_type=jnp.float32))  # [S, D] f32
        ctx = jnp.concatenate(ctx_parts, axis=0).astype(jnp.bfloat16)      # [B*S, D]
        attn_dense = attn_dense + jnp.dot(ctx, wd[c0:c0 + HEAD_DIM, :],
                                          preferred_element_type=jnp.float32)
    attn_dense = attn_dense + bd                                  # [B*S, H]
    attn_out = x + attn_dense                                     # dropout_add (eval)

    # ---- post_attention_layernorm + MLP ----
    ln2 = _layernorm(attn_out, ln2_g, ln2_b)
    h4 = jnp.dot(ln2.astype(jnp.bfloat16), w1_ref[...],
                 preferred_element_type=jnp.float32) + b1
    g = _bloom_gelu(h4)
    mlp = jnp.dot(g.astype(jnp.bfloat16), w2_ref[...],
                  preferred_element_type=jnp.float32) + b2

    out_ref[...] = attn_out + mlp


def prepare_params(params):
    """One-time constant transform of the raw (PyTorch-layout) parameters."""
    (ln1_g, ln1_b, wqkv_t, bqkv, wd_t, bd, ln2_g, ln2_b, w1_t, b1, w2_t, b2) = params

    # Bloom fused-QKV column layout is (head, {q,k,v}, dim); permute to [Q|K|V] with
    # heads contiguous, and fold 1/sqrt(head_dim) into the Q columns + Q bias.
    idx = np.arange(3 * HIDDEN).reshape(N_HEAD, 3, HEAD_DIM)
    perm = np.concatenate([idx[:, j, :].reshape(-1) for j in range(3)])
    col_scale = np.concatenate([np.full(HIDDEN, INV_NORM, np.float32),
                                np.ones(2 * HIDDEN, np.float32)])
    wqkv_p = (wqkv_t[:, perm] * col_scale[None, :]).astype(jnp.bfloat16)
    bqkv_p = bqkv.reshape(-1)[perm] * col_scale

    # Pack all small vectors into a single [8, PACK_W] array (one DMA).
    vecs = jnp.zeros((8, PACK_W), jnp.float32)
    vecs = vecs.at[0, :HIDDEN].set(ln1_g.reshape(-1))
    vecs = vecs.at[1, :HIDDEN].set(ln1_b.reshape(-1))
    vecs = vecs.at[2, :3 * HIDDEN].set(bqkv_p)
    vecs = vecs.at[3, :HIDDEN].set(bd.reshape(-1))
    vecs = vecs.at[4, :HIDDEN].set(ln2_g.reshape(-1))
    vecs = vecs.at[5, :HIDDEN].set(ln2_b.reshape(-1))
    vecs = vecs.at[6, :FFN].set(b1.reshape(-1))
    vecs = vecs.at[7, :HIDDEN].set(b2.reshape(-1))

    return dict(
        wqkv=wqkv_p,
        wd=wd_t.astype(jnp.bfloat16),
        w1=w1_t.astype(jnp.bfloat16),
        w2=w2_t.astype(jnp.bfloat16),
        vecs=vecs,
    )


def bloom_block(hidden, alibi, mask_f, prepped):
    """hidden: [B,S,H]; alibi: [B*H,1,S]; mask_f: [B,1,S,S] float (1.0 = masked)."""
    B, S, H = hidden.shape
    # Combined additive attention bias: alibi (per key) + large negative where masked.
    bias = alibi.reshape(B, N_HEAD, 1, S) + MASK_BIAS * mask_f      # [B, NH, S, S]
    x2 = hidden.reshape(B * S, H)

    vmem = pl.BlockSpec(memory_space=pltpu.MemorySpace.VMEM)
    out = pl.pallas_call(
        bloom_block_kernel,
        out_shape=jax.ShapeDtypeStruct((B * S, H), jnp.float32),
        in_specs=[vmem] * 7,
        out_specs=vmem,
    )(x2, bias, prepped["wqkv"], prepped["wd"], prepped["w1"], prepped["w2"],
      prepped["vecs"])
    return out.reshape(B, S, H)


def reference(hidden, alibi, mask_bool, params):
    """Pure-JAX f32 reference mirroring the PyTorch BloomBlock forward (eval mode)."""
    (ln1_g, ln1_b, wqkv_t, bqkv, wd_t, bd,
     ln2_g, ln2_b, w1_t, b1, w2_t, b2) = params
    B, S, H = hidden.shape

    def ln(x, g, b):
        mu = x.mean(-1, keepdims=True)
        var = ((x - mu) ** 2).mean(-1, keepdims=True)
        return (x - mu) / jnp.sqrt(var + EPS) * g + b

    ln1 = ln(hidden, ln1_g[0], ln1_b[0])
    residual = hidden
    qkv = ln1 @ wqkv_t + bqkv[0]
    qkv = qkv.reshape(B, S, N_HEAD, 3, HEAD_DIM)
    q = qkv[..., 0, :].transpose(0, 2, 1, 3)
    k = qkv[..., 1, :].transpose(0, 2, 1, 3)
    v = qkv[..., 2, :].transpose(0, 2, 1, 3)
    scores = alibi.reshape(B, N_HEAD, 1, S) + INV_NORM * jnp.einsum('bhqd,bhkd->bhqk', q, k)
    masked = jnp.where(mask_bool, MASK_VALUE, scores)
    probs = jax.nn.softmax(masked, axis=-1)
    ctx = jnp.einsum('bhqk,bhkd->bhqd', probs, v).transpose(0, 2, 1, 3).reshape(B, S, H)
    attn_out = residual + (ctx @ wd_t + bd[0])
    ln2v = ln(attn_out, ln2_g[0], ln2_b[0])
    h4 = ln2v @ w1_t + b1[0]
    g = h4 * 0.5 * (1.0 + jnp.tanh(0.79788456 * h4 * (1.0 + 0.044715 * h4 * h4)))
    return attn_out + (g @ w2_t + b2[0])


if __name__ == "__main__":
    key = jax.random.PRNGKey(0)
    keys = jax.random.split(key, 16)

    hidden = jax.random.normal(keys[0], (BATCH, SEQ, HIDDEN), jnp.float32)

    # Bloom-style alibi: per-head slope * position, shape [B*H, 1, S]
    slopes = jnp.array([2.0 ** (-8.0 * (i + 1) / N_HEAD) for i in range(N_HEAD)], jnp.float32)
    pos = jnp.arange(SEQ, dtype=jnp.float32)
    alibi = jnp.tile((slopes[:, None] * pos[None, :])[None], (BATCH, 1, 1))
    alibi = alibi.reshape(BATCH * N_HEAD, 1, SEQ)

    # Causal boolean attention mask [B, 1, S, S]; True == masked position
    causal = jnp.triu(jnp.ones((SEQ, SEQ), dtype=jnp.bool_), k=1)
    mask_bool = jnp.broadcast_to(causal[None, None], (BATCH, 1, SEQ, SEQ))
    mask_f = mask_bool.astype(jnp.float32)

    def init(k, shape, scale=0.02):
        return scale * jax.random.normal(k, shape, jnp.float32)

    # Deterministic synthetic parameters (Linear weights pre-transposed to [in, out],
    # original Bloom fused-QKV column interleaving).
    ln1_g = jnp.ones((1, HIDDEN), jnp.float32)
    ln1_b = jnp.zeros((1, HIDDEN), jnp.float32)
    ln2_g = jnp.ones((1, HIDDEN), jnp.float32)
    ln2_b = jnp.zeros((1, HIDDEN), jnp.float32)
    wqkv_t = init(keys[1], (HIDDEN, 3 * HIDDEN))
    bqkv = init(keys[2], (1, 3 * HIDDEN))
    wd_t = init(keys[3], (HIDDEN, HIDDEN))
    bd = init(keys[4], (1, HIDDEN))
    w1_t = init(keys[5], (HIDDEN, FFN))
    b1 = init(keys[6], (1, FFN))
    w2_t = init(keys[7], (FFN, HIDDEN))
    b2 = init(keys[8], (1, HIDDEN))
    params = (ln1_g, ln1_b, wqkv_t, bqkv, wd_t, bd, ln2_g, ln2_b, w1_t, b1, w2_t, b2)

    prepped = prepare_params(params)   # one-time: permute/scale QKV, bf16 weights, pack vecs

    out = jax.block_until_ready(bloom_block(hidden, alibi, mask_f, prepped))
    ref = reference(hidden, alibi, mask_bool, params)
    # bf16 MXU operands + approx-reciprocal softmax => slightly looser tolerance.
    np.testing.assert_allclose(np.asarray(out), np.asarray(ref), rtol=1e-2, atol=1e-2)
    print("KERNEL_OK")
</pallas_src>

<mosaic_0001>
module attributes {stable_mosaic.version = 11 : i64} {
  func.func @bloom_block_kernel(%arg0: memref<16x32xf32, #tpu.memory_space<vmem>>, %arg1: memref<2x4x8x8xf32, #tpu.memory_space<vmem>>, %arg2: memref<32x96xbf16, #tpu.memory_space<vmem>>, %arg3: memref<32x32xbf16, #tpu.memory_space<vmem>>, %arg4: memref<32x128xbf16, #tpu.memory_space<vmem>>, %arg5: memref<128x32xbf16, #tpu.memory_space<vmem>>, %arg6: memref<8x128xf32, #tpu.memory_space<vmem>>, %arg7: memref<16x32xf32, #tpu.memory_space<vmem>>) attributes {dimension_semantics = [], scalar_prefetch = 0 : i64, scratch_operands = 0 : i64, tpu.core_type = #tpu.core_type<tc>} {
    %c0 = arith.constant 0 : index
    %c0_0 = arith.constant 0 : index
    %0 = vector.load %arg0[%c0, %c0_0] : memref<16x32xf32, #tpu.memory_space<vmem>>, vector<16x32xf32>
    %c0_1 = arith.constant 0 : index
    %c0_2 = arith.constant 0 : index
    %1 = vector.load %arg6[%c0_1, %c0_2] : memref<8x128xf32, #tpu.memory_space<vmem>>, vector<8x128xf32>
    %2 = vector.extract_strided_slice %1 {offsets = [0, 0], sizes = [1, 32], strides = [1, 1]} : vector<8x128xf32> to vector<1x32xf32>
    %3 = vector.extract_strided_slice %1 {offsets = [1, 0], sizes = [1, 32], strides = [1, 1]} : vector<8x128xf32> to vector<1x32xf32>
    %4 = vector.extract_strided_slice %1 {offsets = [2, 0], sizes = [1, 96], strides = [1, 1]} : vector<8x128xf32> to vector<1x96xf32>
    %5 = vector.extract_strided_slice %1 {offsets = [3, 0], sizes = [1, 32], strides = [1, 1]} : vector<8x128xf32> to vector<1x32xf32>
    %6 = vector.extract_strided_slice %1 {offsets = [4, 0], sizes = [1, 32], strides = [1, 1]} : vector<8x128xf32> to vector<1x32xf32>
    %7 = vector.extract_strided_slice %1 {offsets = [5, 0], sizes = [1, 32], strides = [1, 1]} : vector<8x128xf32> to vector<1x32xf32>
    %8 = vector.extract_strided_slice %1 {offsets = [6, 0], sizes = [1, 128], strides = [1, 1]} : vector<8x128xf32> to vector<1x128xf32>
    %9 = vector.extract_strided_slice %1 {offsets = [7, 0], sizes = [1, 32], strides = [1, 1]} : vector<8x128xf32> to vector<1x32xf32>
    %cst = arith.constant dense<0.000000e+00> : vector<16xf32>
    %10 = vector.multi_reduction <add>, %0, %cst [1] : vector<16x32xf32> to vector<16xf32>
    %11 = vector.shape_cast %10 : vector<16xf32> to vector<16x1xf32>
    %cst_3 = arith.constant 3.200000e+01 : f32
    %12 = vector.broadcast %cst_3 : f32 to vector<16x1xf32>
    %13 = arith.divf %11, %12 : vector<16x1xf32>
    %14 = vector.broadcast %13 : vector<16x1xf32> to vector<16x32xf32>
    %15 = arith.subf %0, %14 : vector<16x32xf32>
    %16 = arith.mulf %15, %15 : vector<16x32xf32>
    %cst_4 = arith.constant dense<0.000000e+00> : vector<16xf32>
    %17 = vector.multi_reduction <add>, %16, %cst_4 [1] : vector<16x32xf32> to vector<16xf32>
    %18 = vector.shape_cast %17 : vector<16xf32> to vector<16x1xf32>
    %cst_5 = arith.constant 3.200000e+01 : f32
    %19 = vector.broadcast %cst_5 : f32 to vector<16x1xf32>
    %20 = arith.divf %18, %19 : vector<16x1xf32>
    %21 = vector.broadcast %13 : vector<16x1xf32> to vector<16x32xf32>
    %22 = arith.subf %0, %21 : vector<16x32xf32>
    %cst_6 = arith.constant 9.99999974E-6 : f32
    %23 = vector.broadcast %cst_6 : f32 to vector<16x1xf32>
    %24 = arith.addf %20, %23 : vector<16x1xf32>
    %25 = math.rsqrt %24 : vector<16x1xf32>
    %26 = vector.broadcast %25 : vector<16x1xf32> to vector<16x32xf32>
    %27 = arith.mulf %22, %26 : vector<16x32xf32>
    %28 = vector.broadcast %2 : vector<1x32xf32> to vector<16x32xf32>
    %29 = arith.mulf %27, %28 : vector<16x32xf32>
    %30 = vector.broadcast %3 : vector<1x32xf32> to vector<16x32xf32>
    %31 = arith.addf %29, %30 : vector<16x32xf32>
    %32 = arith.truncf %31 : vector<16x32xf32> to vector<16x32xbf16>
    %c0_7 = arith.constant 0 : index
    %c0_8 = arith.constant 0 : index
    %33 = vector.load %arg2[%c0_7, %c0_8] : memref<32x96xbf16, #tpu.memory_space<vmem>>, vector<32x96xbf16>
    %cst_9 = arith.constant dense<0.000000e+00> : vector<16x96xf32>
    %34 = tpu.matmul %32, %33, %cst_9 {dimension_numbers = #tpu.dot_dimension_numbers<[1], [0], [0], [1], [0, 0, 1, 1], [], []>} : vector<16x32xbf16>, vector<32x96xbf16>, vector<16x96xf32> -> vector<16x96xf32>
    %35 = vector.broadcast %4 : vector<1x96xf32> to vector<16x96xf32>
    %36 = arith.addf %34, %35 : vector<16x96xf32>
    %37 = arith.truncf %36 : vector<16x96xf32> to vector<16x96xbf16>
    %c0_10 = arith.constant 0 : index
    %c0_11 = arith.constant 0 : index
    %38 = vector.load %arg3[%c0_10, %c0_11] : memref<32x32xbf16, #tpu.memory_space<vmem>>, vector<32x32xbf16>
    %cst_12 = arith.constant 0.000000e+00 : f32
    %39 = vector.broadcast %cst_12 : f32 to vector<16x32xf32>
    %40 = vector.extract_strided_slice %37 {offsets = [0, 0], sizes = [16, 8], strides = [1, 1]} : vector<16x96xbf16> to vector<16x8xbf16>
    %41 = vector.extract_strided_slice %37 {offsets = [0, 32], sizes = [16, 8], strides = [1, 1]} : vector<16x96xbf16> to vector<16x8xbf16>
    %42 = vector.extract_strided_slice %37 {offsets = [0, 64], sizes = [16, 8], strides = [1, 1]} : vector<16x96xbf16> to vector<16x8xbf16>
    %43 = vector.extract_strided_slice %40 {offsets = [0, 0], sizes = [8, 8], strides = [1, 1]} : vector<16x8xbf16> to vector<8x8xbf16>
    %44 = vector.extract_strided_slice %41 {offsets = [0, 0], sizes = [8, 8], strides = [1, 1]} : vector<16x8xbf16> to vector<8x8xbf16>
    %45 = vector.extract_strided_slice %42 {offsets = [0, 0], sizes = [8, 8], strides = [1, 1]} : vector<16x8xbf16> to vector<8x8xbf16>
    %c0_13 = arith.constant 0 : index
    %c0_14 = arith.constant 0 : index
    %c0_15 = arith.constant 0 : index
    %c0_16 = arith.constant 0 : index
    %46 = vector.load %arg1[%c0_13, %c0_14, %c0_15, %c0_16] : memref<2x4x8x8xf32, #tpu.memory_space<vmem>>, vector<1x1x8x8xf32>
    %47 = vector.shape_cast %46 : vector<1x1x8x8xf32> to vector<8x8xf32>
    %cst_17 = arith.constant dense<0.000000e+00> : vector<8x8xf32>
    %48 = tpu.matmul %43, %44, %cst_17 {dimension_numbers = #tpu.dot_dimension_numbers<[1], [1], [0], [0], [0, 0, 1, 0], [], []>} : vector<8x8xbf16>, vector<8x8xbf16>, vector<8x8xf32> -> vector<8x8xf32>
    %49 = arith.addf %47, %48 : vector<8x8xf32>
    %cst_18 = arith.constant dense<0xFF800000> : vector<8xf32>
    %50 = vector.multi_reduction <maximumf>, %49, %cst_18 [1] : vector<8x8xf32> to vector<8xf32>
    %51 = vector.shape_cast %50 : vector<8xf32> to vector<8x1xf32>
    %52 = vector.broadcast %51 : vector<8x1xf32> to vector<8x8xf32>
    %53 = arith.subf %49, %52 : vector<8x8xf32>
    %54 = math.exp %53 : vector<8x8xf32>
    %cst_19 = arith.constant dense<0.000000e+00> : vector<8xf32>
    %55 = vector.multi_reduction <add>, %54, %cst_19 [1] : vector<8x8xf32> to vector<8xf32>
    %56 = vector.shape_cast %55 : vector<8xf32> to vector<8x1xf32>
    %57 = tpu.reciprocal %56 {approx = true} : vector<8x1xf32> -> vector<8x1xf32>
    %58 = vector.broadcast %57 : vector<8x1xf32> to vector<8x8xf32>
    %59 = arith.mulf %54, %58 : vector<8x8xf32>
    %60 = arith.truncf %59 : vector<8x8xf32> to vector<8x8xbf16>
    %cst_20 = arith.constant dense<0.000000e+00> : vector<8x8xf32>
    %61 = tpu.matmul %60, %45, %cst_20 {dimension_numbers = #tpu.dot_dimension_numbers<[1], [0], [0], [1], [0, 0, 1, 1], [], []>} : vector<8x8xbf16>, vector<8x8xbf16>, vector<8x8xf32> -> vector<8x8xf32>
    %62 = vector.extract_strided_slice %40 {offsets = [8, 0], sizes = [8, 8], strides = [1, 1]} : vector<16x8xbf16> to vector<8x8xbf16>
    %63 = vector.extract_strided_slice %41 {offsets = [8, 0], sizes = [8, 8], strides = [1, 1]} : vector<16x8xbf16> to vector<8x8xbf16>
    %64 = vector.extract_strided_slice %42 {offsets = [8, 0], sizes = [8, 8], strides = [1, 1]} : vector<16x8xbf16> to vector<8x8xbf16>
    %c1 = arith.constant 1 : index
    %c0_21 = arith.constant 0 : index
    %c0_22 = arith.constant 0 : index
    %c0_23 = arith.constant 0 : index
    %65 = vector.load %arg1[%c1, %c0_21, %c0_22, %c0_23] : memref<2x4x8x8xf32, #tpu.memory_space<vmem>>, vector<1x1x8x8xf32>
    %66 = vector.shape_cast %65 : vector<1x1x8x8xf32> to vector<8x8xf32>
    %cst_24 = arith.constant dense<0.000000e+00> : vector<8x8xf32>
    %67 = tpu.matmul %62, %63, %cst_24 {dimension_numbers = #tpu.dot_dimension_numbers<[1], [1], [0], [0], [0, 0, 1, 0], [], []>} : vector<8x8xbf16>, vector<8x8xbf16>, vector<8x8xf32> -> vector<8x8xf32>
    %68 = arith.addf %66, %67 : vector<8x8xf32>
    %cst_25 = arith.constant dense<0xFF800000> : vector<8xf32>
    %69 = vector.multi_reduction <maximumf>, %68, %cst_25 [1] : vector<8x8xf32> to vector<8xf32>
    %70 = vector.shape_cast %69 : vector<8xf32> to vector<8x1xf32>
    %71 = vector.broadcast %70 : vector<8x1xf32> to vector<8x8xf32>
    %72 = arith.subf %68, %71 : vector<8x8xf32>
    %73 = math.exp %72 : vector<8x8xf32>
    %cst_26 = arith.constant dense<0.000000e+00> : vector<8xf32>
    %74 = vector.multi_reduction <add>, %73, %cst_26 [1] : vector<8x8xf32> to vector<8xf32>
    %75 = vector.shape_cast %74 : vector<8xf32> to vector<8x1xf32>
    %76 = tpu.reciprocal %75 {approx = true} : vector<8x1xf32> -> vector<8x1xf32>
    %77 = vector.broadcast %76 : vector<8x1xf32> to vector<8x8xf32>
    %78 = arith.mulf %73, %77 : vector<8x8xf32>
    %79 = arith.truncf %78 : vector<8x8xf32> to vector<8x8xbf16>
    %cst_27 = arith.constant dense<0.000000e+00> : vector<8x8xf32>
    %80 = tpu.matmul %79, %64, %cst_27 {dimension_numbers = #tpu.dot_dimension_numbers<[1], [0], [0], [1], [0, 0, 1, 1], [], []>} : vector<8x8xbf16>, vector<8x8xbf16>, vector<8x8xf32> -> vector<8x8xf32>
    %81 = tpu.concatenate %61, %80 in 0 : vector<8x8xf32>, vector<8x8xf32> -> vector<16x8xf32>
    %82 = arith.truncf %81 : vector<16x8xf32> to vector<16x8xbf16>
    %83 = vector.extract_strided_slice %38 {offsets = [0, 0], sizes = [8, 32], strides = [1, 1]} : vector<32x32xbf16> to vector<8x32xbf16>
    %cst_28 = arith.constant dense<0.000000e+00> : vector<16x32xf32>
    %84 = tpu.matmul %82, %83, %cst_28 {dimension_numbers = #tpu.dot_dimension_numbers<[1], [0], [0], [1], [0, 0, 1, 1], [], []>} : vector<16x8xbf16>, vector<8x32xbf16>, vector<16x32xf32> -> vector<16x32xf32>
    %85 = arith.addf %39, %84 : vector<16x32xf32>
    %86 = vector.extract_strided_slice %37 {offsets = [0, 8], sizes = [16, 8], strides = [1, 1]} : vector<16x96xbf16> to vector<16x8xbf16>
    %87 = vector.extract_strided_slice %37 {offsets = [0, 40], sizes = [16, 8], strides = [1, 1]} : vector<16x96xbf16> to vector<16x8xbf16>
    %88 = vector.extract_strided_slice %37 {offsets = [0, 72], sizes = [16, 8], strides = [1, 1]} : vector<16x96xbf16> to vector<16x8xbf16>
    %89 = vector.extract_strided_slice %86 {offsets = [0, 0], sizes = [8, 8], strides = [1, 1]} : vector<16x8xbf16> to vector<8x8xbf16>
    %90 = vector.extract_strided_slice %87 {offsets = [0, 0], sizes = [8, 8], strides = [1, 1]} : vector<16x8xbf16> to vector<8x8xbf16>
    %91 = vector.extract_strided_slice %88 {offsets = [0, 0], sizes = [8, 8], strides = [1, 1]} : vector<16x8xbf16> to vector<8x8xbf16>
    %c0_29 = arith.constant 0 : index
    %c1_30 = arith.constant 1 : index
    %c0_31 = arith.constant 0 : index
    %c0_32 = arith.constant 0 : index
    %92 = vector.load %arg1[%c0_29, %c1_30, %c0_31, %c0_32] : memref<2x4x8x8xf32, #tpu.memory_space<vmem>>, vector<1x1x8x8xf32>
    %93 = vector.shape_cast %92 : vector<1x1x8x8xf32> to vector<8x8xf32>
    %cst_33 = arith.constant dense<0.000000e+00> : vector<8x8xf32>
    %94 = tpu.matmul %89, %90, %cst_33 {dimension_numbers = #tpu.dot_dimension_numbers<[1], [1], [0], [0], [0, 0, 1, 0], [], []>} : vector<8x8xbf16>, vector<8x8xbf16>, vector<8x8xf32> -> vector<8x8xf32>
    %95 = arith.addf %93, %94 : vector<8x8xf32>
    %cst_34 = arith.constant dense<0xFF800000> : vector<8xf32>
    %96 = vector.multi_reduction <maximumf>, %95, %cst_34 [1] : vector<8x8xf32> to vector<8xf32>
    %97 = vector.shape_cast %96 : vector<8xf32> to vector<8x1xf32>
    %98 = vector.broadcast %97 : vector<8x1xf32> to vector<8x8xf32>
    %99 = arith.subf %95, %98 : vector<8x8xf32>
    %100 = math.exp %99 : vector<8x8xf32>
    %cst_35 = arith.constant dense<0.000000e+00> : vector<8xf32>
    %101 = vector.multi_reduction <add>, %100, %cst_35 [1] : vector<8x8xf32> to vector<8xf32>
    %102 = vector.shape_cast %101 : vector<8xf32> to vector<8x1xf32>
    %103 = tpu.reciprocal %102 {approx = true} : vector<8x1xf32> -> vector<8x1xf32>
    %104 = vector.broadcast %103 : vector<8x1xf32> to vector<8x8xf32>
    %105 = arith.mulf %100, %104 : vector<8x8xf32>
    %106 = arith.truncf %105 : vector<8x8xf32> to vector<8x8xbf16>
    %cst_36 = arith.constant dense<0.000000e+00> : vector<8x8xf32>
    %107 = tpu.matmul %106, %91, %cst_36 {dimension_numbers = #tpu.dot_dimension_numbers<[1], [0], [0], [1], [0, 0, 1, 1], [], []>} : vector<8x8xbf16>, vector<8x8xbf16>, vector<8x8xf32> -> vector<8x8xf32>
    %108 = vector.extract_strided_slice %86 {offsets = [8, 0], sizes = [8, 8], strides = [1, 1]} : vector<16x8xbf16> to vector<8x8xbf16>
    %109 = vector.extract_strided_slice %87 {offsets = [8, 0], sizes = [8, 8], strides = [1, 1]} : vector<16x8xbf16> to vector<8x8xbf16>
    %110 = vector.extract_strided_slice %88 {offsets = [8, 0], sizes = [8, 8], strides = [1, 1]} : vector<16x8xbf16> to vector<8x8xbf16>
    %c1_37 = arith.constant 1 : index
    %c1_38 = arith.constant 1 : index
    %c0_39 = arith.constant 0 : index
    %c0_40 = arith.constant 0 : index
    %111 = vector.load %arg1[%c1_37, %c1_38, %c0_39, %c0_40] : memref<2x4x8x8xf32, #tpu.memory_space<vmem>>, vector<1x1x8x8xf32>
    %112 = vector.shape_cast %111 : vector<1x1x8x8xf32> to vector<8x8xf32>
    %cst_41 = arith.constant dense<0.000000e+00> : vector<8x8xf32>
    %113 = tpu.matmul %108, %109, %cst_41 {dimension_numbers = #tpu.dot_dimension_numbers<[1], [1], [0], [0], [0, 0, 1, 0], [], []>} : vector<8x8xbf16>, vector<8x8xbf16>, vector<8x8xf32> -> vector<8x8xf32>
    %114 = arith.addf %112, %113 : vector<8x8xf32>
    %cst_42 = arith.constant dense<0xFF800000> : vector<8xf32>
    %115 = vector.multi_reduction <maximumf>, %114, %cst_42 [1] : vector<8x8xf32> to vector<8xf32>
    %116 = vector.shape_cast %115 : vector<8xf32> to vector<8x1xf32>
    %117 = vector.broadcast %116 : vector<8x1xf32> to vector<8x8xf32>
    %118 = arith.subf %114, %117 : vector<8x8xf32>
    %119 = math.exp %118 : vector<8x8xf32>
    %cst_43 = arith.constant dense<0.000000e+00> : vector<8xf32>
    %120 = vector.multi_reduction <add>, %119, %cst_43 [1] : vector<8x8xf32> to vector<8xf32>
    %121 = vector.shape_cast %120 : vector<8xf32> to vector<8x1xf32>
    %122 = tpu.reciprocal %121 {approx = true} : vector<8x1xf32> -> vector<8x1xf32>
    %123 = vector.broadcast %122 : vector<8x1xf32> to vector<8x8xf32>
    %124 = arith.mulf %119, %123 : vector<8x8xf32>
    %125 = arith.truncf %124 : vector<8x8xf32> to vector<8x8xbf16>
    %cst_44 = arith.constant dense<0.000000e+00> : vector<8x8xf32>
    %126 = tpu.matmul %125, %110, %cst_44 {dimension_numbers = #tpu.dot_dimension_numbers<[1], [0], [0], [1], [0, 0, 1, 1], [], []>} : vector<8x8xbf16>, vector<8x8xbf16>, vector<8x8xf32> -> vector<8x8xf32>
    %127 = tpu.concatenate %107, %126 in 0 : vector<8x8xf32>, vector<8x8xf32> -> vector<16x8xf32>
    %128 = arith.truncf %127 : vector<16x8xf32> to vector<16x8xbf16>
    %129 = vector.extract_strided_slice %38 {offsets = [8, 0], sizes = [8, 32], strides = [1, 1]} : vector<32x32xbf16> to vector<8x32xbf16>
    %cst_45 = arith.constant dense<0.000000e+00> : vector<16x32xf32>
    %130 = tpu.matmul %128, %129, %cst_45 {dimension_numbers = #tpu.dot_dimension_numbers<[1], [0], [0], [1], [0, 0, 1, 1], [], []>} : vector<16x8xbf16>, vector<8x32xbf16>, vector<16x32xf32> -> vector<16x32xf32>
    %131 = arith.addf %85, %130 : vector<16x32xf32>
    %132 = vector.extract_strided_slice %37 {offsets = [0, 16], sizes = [16, 8], strides = [1, 1]} : vector<16x96xbf16> to vector<16x8xbf16>
    %133 = vector.extract_strided_slice %37 {offsets = [0, 48], sizes = [16, 8], strides = [1, 1]} : vector<16x96xbf16> to vector<16x8xbf16>
    %134 = vector.extract_strided_slice %37 {offsets = [0, 80], sizes = [16, 8], strides = [1, 1]} : vector<16x96xbf16> to vector<16x8xbf16>
    %135 = vector.extract_strided_slice %132 {offsets = [0, 0], sizes = [8, 8], strides = [1, 1]} : vector<16x8xbf16> to vector<8x8xbf16>
    %136 = vector.extract_strided_slice %133 {offsets = [0, 0], sizes = [8, 8], strides = [1, 1]} : vector<16x8xbf16> to vector<8x8xbf16>
    %137 = vector.extract_strided_slice %134 {offsets = [0, 0], sizes = [8, 8], strides = [1, 1]} : vector<16x8xbf16> to vector<8x8xbf16>
    %c0_46 = arith.constant 0 : index
    %c2 = arith.constant 2 : index
    %c0_47 = arith.constant 0 : index
    %c0_48 = arith.constant 0 : index
    %138 = vector.load %arg1[%c0_46, %c2, %c0_47, %c0_48] : memref<2x4x8x8xf32, #tpu.memory_space<vmem>>, vector<1x1x8x8xf32>
    %139 = vector.shape_cast %138 : vector<1x1x8x8xf32> to vector<8x8xf32>
    %cst_49 = arith.constant dense<0.000000e+00> : vector<8x8xf32>
    %140 = tpu.matmul %135, %136, %cst_49 {dimension_numbers = #tpu.dot_dimension_numbers<[1], [1], [0], [0], [0, 0, 1, 0], [], []>} : vector<8x8xbf16>, vector<8x8xbf16>, vector<8x8xf32> -> vector<8x8xf32>
    %141 = arith.addf %139, %140 : vector<8x8xf32>
    %cst_50 = arith.constant dense<0xFF800000> : vector<8xf32>
    %142 = vector.multi_reduction <maximumf>, %141, %cst_50 [1] : vector<8x8xf32> to vector<8xf32>
    %143 = vector.shape_cast %142 : vector<8xf32> to vector<8x1xf32>
    %144 = vector.broadcast %143 : vector<8x1xf32> to vector<8x8xf32>
    %145 = arith.subf %141, %144 : vector<8x8xf32>
    %146 = math.exp %145 : vector<8x8xf32>
    %cst_51 = arith.constant dense<0.000000e+00> : vector<8xf32>
    %147 = vector.multi_reduction <add>, %146, %cst_51 [1] : vector<8x8xf32> to vector<8xf32>
    %148 = vector.shape_cast %147 : vector<8xf32> to vector<8x1xf32>
    %149 = tpu.reciprocal %148 {approx = true} : vector<8x1xf32> -> vector<8x1xf32>
    %150 = vector.broadcast %149 : vector<8x1xf32> to vector<8x8xf32>
    %151 = arith.mulf %146, %150 : vector<8x8xf32>
    %152 = arith.truncf %151 : vector<8x8xf32> to vector<8x8xbf16>
    %cst_52 = arith.constant dense<0.000000e+00> : vector<8x8xf32>
    %153 = tpu.matmul %152, %137, %cst_52 {dimension_numbers = #tpu.dot_dimension_numbers<[1], [0], [0], [1], [0, 0, 1, 1], [], []>} : vector<8x8xbf16>, vector<8x8xbf16>, vector<8x8xf32> -> vector<8x8xf32>
    %154 = vector.extract_strided_slice %132 {offsets = [8, 0], sizes = [8, 8], strides = [1, 1]} : vector<16x8xbf16> to vector<8x8xbf16>
    %155 = vector.extract_strided_slice %133 {offsets = [8, 0], sizes = [8, 8], strides = [1, 1]} : vector<16x8xbf16> to vector<8x8xbf16>
    %156 = vector.extract_strided_slice %134 {offsets = [8, 0], sizes = [8, 8], strides = [1, 1]} : vector<16x8xbf16> to vector<8x8xbf16>
    %c1_53 = arith.constant 1 : index
    %c2_54 = arith.constant 2 : index
    %c0_55 = arith.constant 0 : index
    %c0_56 = arith.constant 0 : index
    %157 = vector.load %arg1[%c1_53, %c2_54, %c0_55, %c0_56] : memref<2x4x8x8xf32, #tpu.memory_space<vmem>>, vector<1x1x8x8xf32>
    %158 = vector.shape_cast %157 : vector<1x1x8x8xf32> to vector<8x8xf32>
    %cst_57 = arith.constant dense<0.000000e+00> : vector<8x8xf32>
    %159 = tpu.matmul %154, %155, %cst_57 {dimension_numbers = #tpu.dot_dimension_numbers<[1], [1], [0], [0], [0, 0, 1, 0], [], []>} : vector<8x8xbf16>, vector<8x8xbf16>, vector<8x8xf32> -> vector<8x8xf32>
    %160 = arith.addf %158, %159 : vector<8x8xf32>
    %cst_58 = arith.constant dense<0xFF800000> : vector<8xf32>
    %161 = vector.multi_reduction <maximumf>, %160, %cst_58 [1] : vector<8x8xf32> to vector<8xf32>
    %162 = vector.shape_cast %161 : vector<8xf32> to vector<8x1xf32>
    %163 = vector.broadcast %162 : vector<8x1xf32> to vector<8x8xf32>
    %164 = arith.subf %160, %163 : vector<8x8xf32>
    %165 = math.exp %164 : vector<8x8xf32>
    %cst_59 = arith.constant dense<0.000000e+00> : vector<8xf32>
    %166 = vector.multi_reduction <add>, %165, %cst_59 [1] : vector<8x8xf32> to vector<8xf32>
    %167 = vector.shape_cast %166 : vector<8xf32> to vector<8x1xf32>
    %168 = tpu.reciprocal %167 {approx = true} : vector<8x1xf32> -> vector<8x1xf32>
    %169 = vector.broadcast %168 : vector<8x1xf32> to vector<8x8xf32>
    %170 = arith.mulf %165, %169 : vector<8x8xf32>
    %171 = arith.truncf %170 : vector<8x8xf32> to vector<8x8xbf16>
    %cst_60 = arith.constant dense<0.000000e+00> : vector<8x8xf32>
    %172 = tpu.matmul %171, %156, %cst_60 {dimension_numbers = #tpu.dot_dimension_numbers<[1], [0], [0], [1], [0, 0, 1, 1], [], []>} : vector<8x8xbf16>, vector<8x8xbf16>, vector<8x8xf32> -> vector<8x8xf32>
    %173 = tpu.concatenate %153, %172 in 0 : vector<8x8xf32>, vector<8x8xf32> -> vector<16x8xf32>
    %174 = arith.truncf %173 : vector<16x8xf32> to vector<16x8xbf16>
    %175 = vector.extract_strided_slice %38 {offsets = [16, 0], sizes = [8, 32], strides = [1, 1]} : vector<32x32xbf16> to vector<8x32xbf16>
    %cst_61 = arith.constant dense<0.000000e+00> : vector<16x32xf32>
    %176 = tpu.matmul %174, %175, %cst_61 {dimension_numbers = #tpu.dot_dimension_numbers<[1], [0], [0], [1], [0, 0, 1, 1], [], []>} : vector<16x8xbf16>, vector<8x32xbf16>, vector<16x32xf32> -> vector<16x32xf32>
    %177 = arith.addf %131, %176 : vector<16x32xf32>
    %178 = vector.extract_strided_slice %37 {offsets = [0, 24], sizes = [16, 8], strides = [1, 1]} : vector<16x96xbf16> to vector<16x8xbf16>
    %179 = vector.extract_strided_slice %37 {offsets = [0, 56], sizes = [16, 8], strides = [1, 1]} : vector<16x96xbf16> to vector<16x8xbf16>
    %180 = vector.extract_strided_slice %37 {offsets = [0, 88], sizes = [16, 8], strides = [1, 1]} : vector<16x96xbf16> to vector<16x8xbf16>
    %181 = vector.extract_strided_slice %178 {offsets = [0, 0], sizes = [8, 8], strides = [1, 1]} : vector<16x8xbf16> to vector<8x8xbf16>
    %182 = vector.extract_strided_slice %179 {offsets = [0, 0], sizes = [8, 8], strides = [1, 1]} : vector<16x8xbf16> to vector<8x8xbf16>
    %183 = vector.extract_strided_slice %180 {offsets = [0, 0], sizes = [8, 8], strides = [1, 1]} : vector<16x8xbf16> to vector<8x8xbf16>
    %c0_62 = arith.constant 0 : index
    %c3 = arith.constant 3 : index
    %c0_63 = arith.constant 0 : index
    %c0_64 = arith.constant 0 : index
    %184 = vector.load %arg1[%c0_62, %c3, %c0_63, %c0_64] : memref<2x4x8x8xf32, #tpu.memory_space<vmem>>, vector<1x1x8x8xf32>
    %185 = vector.shape_cast %184 : vector<1x1x8x8xf32> to vector<8x8xf32>
    %cst_65 = arith.constant dense<0.000000e+00> : vector<8x8xf32>
    %186 = tpu.matmul %181, %182, %cst_65 {dimension_numbers = #tpu.dot_dimension_numbers<[1], [1], [0], [0], [0, 0, 1, 0], [], []>} : vector<8x8xbf16>, vector<8x8xbf16>, vector<8x8xf32> -> vector<8x8xf32>
    %187 = arith.addf %185, %186 : vector<8x8xf32>
    %cst_66 = arith.constant dense<0xFF800000> : vector<8xf32>
    %188 = vector.multi_reduction <maximumf>, %187, %cst_66 [1] : vector<8x8xf32> to vector<8xf32>
    %189 = vector.shape_cast %188 : vector<8xf32> to vector<8x1xf32>
    %190 = vector.broadcast %189 : vector<8x1xf32> to vector<8x8xf32>
    %191 = arith.subf %187, %190 : vector<8x8xf32>
    %192 = math.exp %191 : vector<8x8xf32>
    %cst_67 = arith.constant dense<0.000000e+00> : vector<8xf32>
    %193 = vector.multi_reduction <add>, %192, %cst_67 [1] : vector<8x8xf32> to vector<8xf32>
    %194 = vector.shape_cast %193 : vector<8xf32> to vector<8x1xf32>
    %195 = tpu.reciprocal %194 {approx = true} : vector<8x1xf32> -> vector<8x1xf32>
    %196 = vector.broadcast %195 : vector<8x1xf32> to vector<8x8xf32>
    %197 = arith.mulf %192, %196 : vector<8x8xf32>
    %198 = arith.truncf %197 : vector<8x8xf32> to vector<8x8xbf16>
    %cst_68 = arith.constant dense<0.000000e+00> : vector<8x8xf32>
    %199 = tpu.matmul %198, %183, %cst_68 {dimension_numbers = #tpu.dot_dimension_numbers<[1], [0], [0], [1], [0, 0, 1, 1], [], []>} : vector<8x8xbf16>, vector<8x8xbf16>, vector<8x8xf32> -> vector<8x8xf32>
    %200 = vector.extract_strided_slice %178 {offsets = [8, 0], sizes = [8, 8], strides = [1, 1]} : vector<16x8xbf16> to vector<8x8xbf16>
    %201 = vector.extract_strided_slice %179 {offsets = [8, 0], sizes = [8, 8], strides = [1, 1]} : vector<16x8xbf16> to vector<8x8xbf16>
    %202 = vector.extract_strided_slice %180 {offsets = [8, 0], sizes = [8, 8], strides = [1, 1]} : vector<16x8xbf16> to vector<8x8xbf16>
    %c1_69 = arith.constant 1 : index
    %c3_70 = arith.constant 3 : index
    %c0_71 = arith.constant 0 : index
    %c0_72 = arith.constant 0 : index
    %203 = vector.load %arg1[%c1_69, %c3_70, %c0_71, %c0_72] : memref<2x4x8x8xf32, #tpu.memory_space<vmem>>, vector<1x1x8x8xf32>
    %204 = vector.shape_cast %203 : vector<1x1x8x8xf32> to vector<8x8xf32>
    %cst_73 = arith.constant dense<0.000000e+00> : vector<8x8xf32>
    %205 = tpu.matmul %200, %201, %cst_73 {dimension_numbers = #tpu.dot_dimension_numbers<[1], [1], [0], [0], [0, 0, 1, 0], [], []>} : vector<8x8xbf16>, vector<8x8xbf16>, vector<8x8xf32> -> vector<8x8xf32>
    %206 = arith.addf %204, %205 : vector<8x8xf32>
    %cst_74 = arith.constant dense<0xFF800000> : vector<8xf32>
    %207 = vector.multi_reduction <maximumf>, %206, %cst_74 [1] : vector<8x8xf32> to vector<8xf32>
    %208 = vector.shape_cast %207 : vector<8xf32> to vector<8x1xf32>
    %209 = vector.broadcast %208 : vector<8x1xf32> to vector<8x8xf32>
    %210 = arith.subf %206, %209 : vector<8x8xf32>
    %211 = math.exp %210 : vector<8x8xf32>
    %cst_75 = arith.constant dense<0.000000e+00> : vector<8xf32>
    %212 = vector.multi_reduction <add>, %211, %cst_75 [1] : vector<8x8xf32> to vector<8xf32>
    %213 = vector.shape_cast %212 : vector<8xf32> to vector<8x1xf32>
    %214 = tpu.reciprocal %213 {approx = true} : vector<8x1xf32> -> vector<8x1xf32>
    %215 = vector.broadcast %214 : vector<8x1xf32> to vector<8x8xf32>
    %216 = arith.mulf %211, %215 : vector<8x8xf32>
    %217 = arith.truncf %216 : vector<8x8xf32> to vector<8x8xbf16>
    %cst_76 = arith.constant dense<0.000000e+00> : vector<8x8xf32>
    %218 = tpu.matmul %217, %202, %cst_76 {dimension_numbers = #tpu.dot_dimension_numbers<[1], [0], [0], [1], [0, 0, 1, 1], [], []>} : vector<8x8xbf16>, vector<8x8xbf16>, vector<8x8xf32> -> vector<8x8xf32>
    %219 = tpu.concatenate %199, %218 in 0 : vector<8x8xf32>, vector<8x8xf32> -> vector<16x8xf32>
    %220 = arith.truncf %219 : vector<16x8xf32> to vector<16x8xbf16>
    %221 = vector.extract_strided_slice %38 {offsets = [24, 0], sizes = [8, 32], strides = [1, 1]} : vector<32x32xbf16> to vector<8x32xbf16>
    %cst_77 = arith.constant dense<0.000000e+00> : vector<16x32xf32>
    %222 = tpu.matmul %220, %221, %cst_77 {dimension_numbers = #tpu.dot_dimension_numbers<[1], [0], [0], [1], [0, 0, 1, 1], [], []>} : vector<16x8xbf16>, vector<8x32xbf16>, vector<16x32xf32> -> vector<16x32xf32>
    %223 = arith.addf %177, %222 : vector<16x32xf32>
    %224 = vector.broadcast %5 : vector<1x32xf32> to vector<16x32xf32>
    %225 = arith.addf %223, %224 : vector<16x32xf32>
    %226 = arith.addf %0, %225 : vector<16x32xf32>
    %cst_78 = arith.constant dense<0.000000e+00> : vector<16xf32>
    %227 = vector.multi_reduction <add>, %226, %cst_78 [1] : vector<16x32xf32> to vector<16xf32>
    %228 = vector.shape_cast %227 : vector<16xf32> to vector<16x1xf32>
    %cst_79 = arith.constant 3.200000e+01 : f32
    %229 = vector.broadcast %cst_79 : f32 to vector<16x1xf32>
    %230 = arith.divf %228, %229 : vector<16x1xf32>
    %231 = vector.broadcast %230 : vector<16x1xf32> to vector<16x32xf32>
    %232 = arith.subf %226, %231 : vector<16x32xf32>
    %233 = arith.mulf %232, %232 : vector<16x32xf32>
    %cst_80 = arith.constant dense<0.000000e+00> : vector<16xf32>
    %234 = vector.multi_reduction <add>, %233, %cst_80 [1] : vector<16x32xf32> to vector<16xf32>
    %235 = vector.shape_cast %234 : vector<16xf32> to vector<16x1xf32>
    %cst_81 = arith.constant 3.200000e+01 : f32
    %236 = vector.broadcast %cst_81 : f32 to vector<16x1xf32>
    %237 = arith.divf %235, %236 : vector<16x1xf32>
    %238 = vector.broadcast %230 : vector<16x1xf32> to vector<16x32xf32>
    %239 = arith.subf %226, %238 : vector<16x32xf32>
    %cst_82 = arith.constant 9.99999974E-6 : f32
    %240 = vector.broadcast %cst_82 : f32 to vector<16x1xf32>
    %241 = arith.addf %237, %240 : vector<16x1xf32>
    %242 = math.rsqrt %241 : vector<16x1xf32>
    %243 = vector.broadcast %242 : vector<16x1xf32> to vector<16x32xf32>
    %244 = arith.mulf %239, %243 : vector<16x32xf32>
    %245 = vector.broadcast %6 : vector<1x32xf32> to vector<16x32xf32>
    %246 = arith.mulf %244, %245 : vector<16x32xf32>
    %247 = vector.broadcast %7 : vector<1x32xf32> to vector<16x32xf32>
    %248 = arith.addf %246, %247 : vector<16x32xf32>
    %249 = arith.truncf %248 : vector<16x32xf32> to vector<16x32xbf16>
    %c0_83 = arith.constant 0 : index
    %c0_84 = arith.constant 0 : index
    %250 = vector.load %arg4[%c0_83, %c0_84] : memref<32x128xbf16, #tpu.memory_space<vmem>>, vector<32x128xbf16>
    %cst_85 = arith.constant dense<0.000000e+00> : vector<16x128xf32>
    %251 = tpu.matmul %249, %250, %cst_85 {dimension_numbers = #tpu.dot_dimension_numbers<[1], [0], [0], [1], [0, 0, 1, 1], [], []>} : vector<16x32xbf16>, vector<32x128xbf16>, vector<16x128xf32> -> vector<16x128xf32>
    %252 = vector.broadcast %8 : vector<1x128xf32> to vector<16x128xf32>
    %253 = arith.addf %251, %252 : vector<16x128xf32>
    %cst_86 = arith.constant 5.000000e-01 : f32
    %254 = vector.broadcast %cst_86 : f32 to vector<16x128xf32>
    %255 = arith.mulf %253, %254 : vector<16x128xf32>
    %cst_87 = arith.constant 0.797884583 : f32
    %256 = vector.broadcast %cst_87 : f32 to vector<16x128xf32>
    %257 = arith.mulf %256, %253 : vector<16x128xf32>
    %cst_88 = arith.constant 4.471500e-02 : f32
    %258 = vector.broadcast %cst_88 : f32 to vector<16x128xf32>
    %259 = arith.mulf %258, %253 : vector<16x128xf32>
    %260 = arith.mulf %259, %253 : vector<16x128xf32>
    %cst_89 = arith.constant 1.000000e+00 : f32
    %261 = vector.broadcast %cst_89 : f32 to vector<16x128xf32>
    %262 = arith.addf %261, %260 : vector<16x128xf32>
    %263 = arith.mulf %257, %262 : vector<16x128xf32>
    %264 = math.tanh %263 : vector<16x128xf32>
    %cst_90 = arith.constant 1.000000e+00 : f32
    %265 = vector.broadcast %cst_90 : f32 to vector<16x128xf32>
    %266 = arith.addf %265, %264 : vector<16x128xf32>
    %267 = arith.mulf %255, %266 : vector<16x128xf32>
    %268 = arith.truncf %267 : vector<16x128xf32> to vector<16x128xbf16>
    %c0_91 = arith.constant 0 : index
    %c0_92 = arith.constant 0 : index
    %269 = vector.load %arg5[%c0_91, %c0_92] : memref<128x32xbf16, #tpu.memory_space<vmem>>, vector<128x32xbf16>
    %cst_93 = arith.constant dense<0.000000e+00> : vector<16x32xf32>
    %270 = tpu.matmul %268, %269, %cst_93 {dimension_numbers = #tpu.dot_dimension_numbers<[1], [0], [0], [1], [0, 0, 1, 1], [], []>} : vector<16x128xbf16>, vector<128x32xbf16>, vector<16x32xf32> -> vector<16x32xf32>
    %271 = vector.broadcast %9 : vector<1x32xf32> to vector<16x32xf32>
    %272 = arith.addf %270, %271 : vector<16x32xf32>
    %273 = arith.addf %226, %272 : vector<16x32xf32>
    %c0_94 = arith.constant 0 : index
    %c0_95 = arith.constant 0 : index
    %274 = vector.load %arg7[%c0_94, %c0_95] : memref<16x32xf32, #tpu.memory_space<vmem>>, vector<16x32xf32>
    tpu.vector_store %arg7[%c0_94, %c0_95], %273 {strides = array<i32>} : memref<16x32xf32, #tpu.memory_space<vmem>>, vector<16x32xf32>,
    return
  }
}

</mosaic_0001>

<bundles_post_ra>
// kernel: tpu_custom_call.1
= control target key start
LH: loop header
LB: loop body
LE: loop exit
PB: predicated region body
PF: predicated region fallthrough
CT: control target
= control target key end

     0   :  { %12 = vsyncpa [#allocation3], 0  ;;  %s2419_s0 = inlined_call_operand.vmem [shape: f32[16,32], index: 0, kind: input, shape index: {}]   ;;  %s2420_s1 = inlined_call_operand.vmem [shape: f32[2,4,8,8], index: 1, kind: input, shape index: {}]   ;;  %s2421_s2 = inlined_call_operand.hbm [shape: bf16[32,96], index: 2, kind: input, shape index: {}]   ;;  %s2422_s3 = inlined_call_operand.hbm [shape: bf16[32,32], index: 3, kind: input, shape index: {}]   ;;  %s2423_s4 = inlined_call_operand.hbm [shape: bf16[32,128], index: 4, kind: input, shape index: {}]   ;;  %s2424_s5 = inlined_call_operand.vmem [shape: bf16[128,32], index: 5, kind: input, shape index: {}]   ;;  %s2425_s6 = inlined_call_operand.hbm [shape: f32[8,128], index: 6, kind: input, shape index: {}]   ;;  %s2426_s7 = inlined_call_operand.hbm [shape: f32[16,32], index: 7, kind: output, shape index: {}]  }
   0x1   :  { %13 = vsyncpa [#allocation6], 0 }
   0x2   :  { %14 = vsyncpa [#allocation9], 0 }
   0x3   :  { %15 = vsyncpa [#allocation4], 0  ;;  %s2002_s24 = smov [#allocation5]   ;;  %s2003_s26 = smov [#allocation2]  }
   0x4   :  { %s37_s25 = sshll.u32 %s2002_s24, 4  ;;  %s25_s27 = sshll.u32 %s2003_s26, 4  ;;  %s38_s25 = int_to_ptr.vmem [resolvable:$true] %s37_s25  ;;  %s2063_s27 = int_to_ptr.vmem [resolvable:$true] %s25_s27 }
   0x5   :  { %s1884_s30 = scalar_lea.hbm %s2422_s3, 256 }
   0x6   :  { %p1885_p0 = scmp.ne.s32.totalorder %s2422_s3, %s1884_s30  ;;  %p1888_p1 = scmp.lt.u32.totalorder %s1884_s30, %s2422_s3 }
   0x8   :  { %p1890_p2 = pnand %p1888_p1, %p1885_p0 }
   0xa   :  { %1893 = shalt.err (!%p1890_p2)
}
   0xb   :  { %s1894_s12 = scalar_lea.vmem %s38_s25, 256  ;;  %p1899_p4 = scmp.lt.s32.totalorder %s38_s25, %s38_s25 }
   0xc   :  { %p1895_p3 = scmp.ne.s32.totalorder %s38_s25, %s1894_s12  ;;  %p1900_p5 = scmp.lt.s32.totalorder %s1894_s12, %s1894_s12 }
   0xe   :  { %p1901_p6 = por %p1900_p5, %p1899_p4 }
  0x10   :  { %p1902_p7 = pnand %p1901_p6, %p1895_p3 }
  0x12   :  { %1905 = shalt.err (!%p1902_p7)
}
  0x13   :  { %s2004_s13 = smov 64   ;;  %s2005_s14 = smov 4  }
  0x14   :  { %43 = dma.hbm_to_vmem [thread:$0]  %s2422_s3, 256, %s38_s25, [#allocation6], %s2004_s13, %s2004_s13, %s2005_s14  }
  0x15   :  { %s1906_s19 = scalar_lea.hbm %s2421_s2, 256 }
  0x16   :  { %p1907_p8 = scmp.ne.s32.totalorder %s2421_s2, %s1906_s19  ;;  %p1910_p9 = scmp.lt.u32.totalorder %s1906_s19, %s2421_s2 }
  0x18   :  { %p1912_p10 = pnand %p1910_p9, %p1907_p8 }
  0x1a   :  { %1915 = shalt.err (!%p1912_p10)
}
  0x1b   :  { %s1916_s24 = scalar_lea.vmem %s2063_s27, 256  ;;  %p1921_p12 = scmp.lt.s32.totalorder %s2063_s27, %s2063_s27 }
  0x1c   :  { %p1917_p11 = scmp.ne.s32.totalorder %s2063_s27, %s1916_s24  ;;  %p1922_p13 = scmp.lt.s32.totalorder %s1916_s24, %s1916_s24 }
  0x1e   :  { %p1923_p0 = por %p1922_p13, %p1921_p12 }
  0x20   :  { %p1924_p1 = pnand %p1923_p0, %p1917_p11 }
  0x22   :  { %1927 = shalt.err (!%p1924_p1)
}
  0x23   :  { %31 = dma.hbm_to_vmem [thread:$0]  %s2421_s2, 256, %s2063_s27, [#allocation3], %s2004_s13, %s2004_s13, %s2005_s14  }
  0x24   :  { %s2006_s26 = smov [#allocation7]   ;;  %s2007_s29 = smov [#allocation8]  }
  0x25   :  { %s49_s28 = sshll.u32 %s2006_s26, 4  ;;  %s64_s30 = sshll.u32 %s2007_s29, 4  ;;  %s50_s28 = int_to_ptr.vmem [resolvable:$true] %s49_s28  ;;  %s65_s30 = int_to_ptr.vmem [resolvable:$true] %s64_s30 }
  0x26   :  { %s1928_s10 = scalar_lea.hbm %s2423_s4, 256 }
  0x27   :  { %p1929_p2 = scmp.ne.s32.totalorder %s2423_s4, %s1928_s10  ;;  %p1932_p3 = scmp.lt.u32.totalorder %s1928_s10, %s2423_s4 }
  0x29   :  { %p1934_p4 = pnand %p1932_p3, %p1929_p2 }
  0x2b   :  { %1937 = shalt.err (!%p1934_p4)
}
  0x2c   :  { %s1938_s2 = scalar_lea.vmem %s50_s28, 256  ;;  %p1943_p6 = scmp.lt.s32.totalorder %s50_s28, %s50_s28 }
  0x2d   :  { %p1939_p5 = scmp.ne.s32.totalorder %s50_s28, %s1938_s2  ;;  %p1944_p7 = scmp.lt.s32.totalorder %s1938_s2, %s1938_s2 }
  0x2f   :  { %p1945_p8 = por %p1944_p7, %p1943_p6 }
  0x31   :  { %p1946_p9 = pnand %p1945_p8, %p1939_p5 }
  0x33   :  { %1949 = shalt.err (!%p1946_p9)
}
  0x34   :  { %55 = dma.hbm_to_vmem [thread:$0]  %s2423_s4, 256, %s50_s28, [#allocation6], %s2004_s13, %s2004_s13, %s2005_s14  }
  0x35   :  { %s1950_s20 = scalar_lea.hbm %s2425_s6, 128 }
  0x36   :  { %p1951_p10 = scmp.ne.s32.totalorder %s2425_s6, %s1950_s20  ;;  %p1954_p11 = scmp.lt.u32.totalorder %s1950_s20, %s2425_s6 }
  0x38   :  { %p1956_p12 = pnand %p1954_p11, %p1951_p10 }
  0x3a   :  { %1959 = shalt.err (!%p1956_p12)
}
  0x3b   :  { %s1960_s3 = scalar_lea.vmem %s65_s30, 128  ;;  %p1965_p0 = scmp.lt.s32.totalorder %s65_s30, %s65_s30 }
  0x3c   :  { %p1961_p13 = scmp.ne.s32.totalorder %s65_s30, %s1960_s3  ;;  %p1966_p1 = scmp.lt.s32.totalorder %s1960_s3, %s1960_s3 }
  0x3e   :  { %p1967_p2 = por %p1966_p1, %p1965_p0 }
  0x40   :  { %p1968_p3 = pnand %p1967_p2, %p1961_p13 }
  0x42   :  { %1971 = shalt.err (!%p1968_p3)
}
  0x43   :  { %67 = dma.hbm_to_vmem [thread:$0]  %s2425_s6, 128, %s65_s30, [#allocation9]  }
  0x44   :  { %1994 = dma.done.wait [#allocation3], 256  }
  0x45   :  { %1995 = vsyncadd [#allocation3], 4294967040 }
  0x46   :  { %1996 = dma.done.wait [#allocation6], 512  }
  0x47   :  { %1997 = vsyncadd [#allocation6], 4294966784 }
  0x48   :  { %1998 = dma.done.wait [#allocation9], 128  }
  0x49   :  { %1999 = vsyncadd [#allocation9], 4294967168  ;;  %vm84_vm0 = vcmask 261120   ;;  %v2130_v0 = vld [vmem:[%s2419_s0] sm:$0xff]  ;;  %v2135_v1 = vld [vmem:[%s2419_s0 + $0x8] sm:$0xff]  ;;  %v2008_v15 = vmov 0.0   ;;  %v112_v21 = vlaneseq }
  0x4a   :  { %v85_v2 = vsel %vm84_vm0, %v2130_v0, 0.0  ;;  %v88_v3 = vsel %vm84_vm0, %v2135_v1, 0.0  ;;  %v1828_v14 = vld [vmem:[#allocation2] sm:$0xff]   ;;  %1651 = vmatprep.subr.bf16.mxu1 %v2008_v15  ;;  %1677 = vmatprep.subr.bf16.mxu0 %v2008_v15  ;;  %v1829_v16 = vld [vmem:[#allocation2 + $0x8] sm:$0xff]   ;;  %vm2009_vm1 = vmmov 0   ;;  %v2156_v26 = vld [vmem:[#allocation8] sm:$0xff] }
  0x4b   :  { %86 = vadd.xlane.f32.xlu0 %v85_v2  ;;  %1652 = vmatpush3.bf16.msra.mxu1 %v1828_v14  ;;  %v2153_v24 = vshrl.u32 %v112_v21, 7  ;;  %s2010_s0 = smov 96   ;;  %s2011_s6 = smov 120   ;;  %vm198_vm2 = vcmask 64512   ;;  %v194_v51 = vld [vmem:[%s2420_s1] sm:$0xff]  ;;  %vm263_vm3 = vcmask 1043456  }
  0x4c   :  { %1655 = vmatprep.mubr.msk.bf16.mxu1 %vm2009_vm1, %v2008_v15  ;;  %1653 = vmatprep.subr.bf16.mxu1 %v2008_v15  ;;  %s2012_s9 = smov 88   ;;  %s2014_s27 = smov 80  }
  0x4d   :  { %1679 = vmatprep.mubr.msk.bf16.mxu0 %vm2009_vm1, %v2008_v15  ;;  %v114_v25 = vsub.s32 0, %v2153_v24  ;;  %v120_v30 = vsub.s32 1, %v2153_v24  ;;  %v131_v39 = vsub.s32 2, %v2153_v24  ;;  %s2015_s17 = smov 112   ;;  %s2016_s22 = smov 48  }
  0x4e   :  { %s2017_s23 = smov 72   ;;  %s2018_s24 = smov 104  }
  0x4f   :  { %89 = vadd.xlane.f32.xlu0 %v88_v3  ;;  %1654 = vmatpush3.bf16.msra.mxu1 %v1829_v16  ;;  %v115_v29 = vrot.slane %v2156_v26, %v114_v25  ;;  %v121_v34 = vrot.slane %v2156_v26, %v120_v30  ;;  %v132_v40 = vrot.slane %v2156_v26, %v131_v39  ;;  %s2019_s26 = smov 40  }
  0x50   :  { %1659 = vmatprep.subr.bf16.mxu1 %v2008_v15 }
  0xd8   :  { %v87_v4 = vpop.xlane.xlu0 %86 }
  0xd9   :  { %v92_v5 = vmul.f32 0.03125, %v87_v4 }
  0xdb   :  { %v94_v6 = vsub.f32 %v2130_v0, %v92_v5 }
  0xdc   :  { %v90_v7 = vpop.xlane.xlu0 %89 }
  0xdd   :  { %v93_v8 = vmul.f32 0.03125, %v90_v7  ;;  %v96_v9 = vmul.f32 %v94_v6, %v94_v6 }
  0xdf   :  { %v95_v10 = vsub.f32 %v2135_v1, %v93_v8  ;;  %v98_v11 = vsel %vm84_vm0, %v96_v9, 0.0 }
  0xe0   :  { %99 = vadd.xlane.f32.xlu1 %v98_v11 }
  0xe1   :  { %v97_v12 = vmul.f32 %v95_v10, %v95_v10 }
  0xe3   :  { %v101_v13 = vsel %vm84_vm0, %v97_v12, 0.0 }
  0xe4   :  { %102 = vadd.xlane.f32.xlu1 %v101_v13 }
 0x16d   :  { %v100_v17 = vpop.xlane.xlu1 %99 }
 0x16e   :  { %v104_v18 = vmul.f32 0.03125, %v100_v17 }
 0x170   :  { %v106_v19 = vadd.f32 1e-05, %v104_v18 }
 0x171   :  { %v103_v20 = vpop.xlane.xlu1 %102 }
 0x172   :  { %1840 = vrsqrt.f32 %v106_v19  ;;  %v105_v22 = vmul.f32 0.03125, %v103_v20  ;;  %v1560_v20 = vld [vmem:[%s2420_s1 + $0x20] sm:$0xff] }
 0x174   :  { %v107_v23 = vadd.f32 1e-05, %v105_v22 }
 0x176   :  { %1842 = vrsqrt.f32 %v107_v23 }
 0x17c   :  { %v1841_v27 = vpop.eup %1840 }
 0x17d   :  { %v110_v28 = vmul.f32 %v1841_v27, %v94_v6 }
 0x17f   :  { %v116_v33 = vmul.f32 %v115_v29, %v110_v28 }
 0x180   :  { %v1843_v31 = vpop.eup %1842 }
 0x181   :  { %v111_v32 = vmul.f32 %v1843_v31, %v95_v10  ;;  %v122_v36 = vadd.f32 %v121_v34, %v116_v33 }
 0x183   :  { %v117_v35 = vmul.f32 %v115_v29, %v111_v32  ;;  %v1563_v29 = vld [vmem:[%s2420_s1 + $0x8] sm:$0xff] }
 0x185   :  { %v123_v37 = vadd.f32 %v121_v34, %v117_v35 }
 0x187   :  { %v124_v38 = vpack.c.bf16 %v123_v37, %v122_v36  ;;  %v1566_v36 = vld [vmem:[%s2420_s1 + $0x28] sm:$0xff] }
 0x189   :  { %1656 = vmatmul.mubr.msk.bf16.vlgmr.msra.gmra.mrb[0].mxu1 %vm84_vm0, %v124_v38 }
 0x18a   :  { %1661 = vmatprep.mubr.msk.bf16.mxu1 %vm2009_vm1, %v2008_v15 }
 0x25c   :  { %v182_v41 = vpop.f32.mrb[0].mxu1 }
 0x25d   :  { %v1657_v42 = vpop.f32.mrb[1].mxu1  ;;  %v183_v44 = vadd.f32 %v182_v41, %v132_v40 }
 0x25e   :  { %v185_v43 = vpop.f32.mrb[2].mxu1 }
 0x25f   :  { %v186_v45 = vadd.f32 %v185_v43, %v132_v40  ;;  %v1658_v46 = vpop.f32.mrb[3].mxu1 }
 0x261   :  { %v2166_v47 = vpack.c.bf16 %v186_v45, %v183_v44 }
 0x263   :  { %196 = vrot.lane.b32.xlu0 %v2166_v47, %s2010_s0  ;;  %v2170_v48 = vrot.slane %v2166_v47, 4 }
 0x267   :  { %310 = vrot.lane.b32.xlu0 %v2170_v48, %s2010_s0 }
 0x26b   :  { %422 = vrot.lane.b32.xlu0 %v2166_v47, %s2011_s6 }
 0x26f   :  { %535 = vrot.lane.b32.xlu0 %v2170_v48, %s2011_s6 }
 0x2d5   :  { %v197_v49 = vpop.permute.xlu0 %196 }
 0x2d6   :  { %v203_v50 = vsel %vm198_vm2, %v197_v49, 0 }
 0x2d7   :  { %1660 = vmatpush3.bf16.xpose.msra.mxu1 %v203_v50 }
 0x2d8   :  { %1665 = vmatprep.subr.bf16.mxu1 %v2008_v15 }
 0x2d9   :  { %v311_v6 = vpop.permute.xlu0 %310 }
 0x2da   :  { %v316_v8 = vsel %vm198_vm2, %v311_v6, 0 }
 0x2dd   :  { %v423_v12 = vpop.permute.xlu0 %422 }
 0x2de   :  { %1662 = vmatmul.mubr.msk.bf16.vlgmr.msra.gmra.mrb[4].mxu1 %vm198_vm2, %v2166_v47 }
 0x2df   :  { %1667 = vmatprep.mubr.msk.bf16.mxu1 %vm2009_vm1, %v2008_v15 }
 0x2e1   :  { %v536_v14 = vpop.permute.xlu0 %535 }
 0x3b1   :  { %v239_v52 = vpop.f32.mrb[4].mxu1 }
 0x3b2   :  { %v245_v53 = vadd.f32 %v239_v52, %v194_v51  ;;  %v1663_v54 = vpop.f32.mrb[5].mxu1 }
 0x3b3   :  { %v242_v55 = vpop.f32.mrb[6].mxu1 }
 0x3b4   :  { %v1664_v56 = vpop.f32.mrb[7].mxu1  ;;  %v246_v57 = vsel %vm198_vm2, %v245_v53, -inf }
 0x3b5   :  { %247 = vmax.xlane.f32.xlu1 %v246_v57 }
 0x442   :  { %v248_v58 = vpop.xlane.xlu1 %247 }
 0x443   :  { %v249_v59 = vsub.f32 %v245_v53, %v248_v58 }
 0x445   :  { %v250_v60 = vmul.f32 1.442695, %v249_v59 }
 0x447   :  { %1844 = vpow2.f32 %v250_v60 }
 0x451   :  { %v1845_v61 = vpop.eup %1844 }
 0x452   :  { %v252_v62 = vsel %vm198_vm2, %v1845_v61, 0.0 }
 0x453   :  { %253 = vadd.xlane.f32.xlu1 %v252_v62 }
 0x464   :  { %258 = vrot.lane.b32.xlu1 %v2166_v47, %s2004_s13 }
 0x468   :  { %424 = vrot.lane.b32.xlu1 %v2166_v47, %s2012_s9 }
 0x46c   :  { %537 = vrot.lane.b32.xlu1 %v2170_v48, %s2012_s9 }
 0x4e0   :  { %v254_v63 = vpop.xlane.xlu1 %253 }
 0x4e1   :  { %1846 = vrcp.f32 %v254_v63 }
 0x4e4   :  { %v259_v2 = vpop.permute.xlu1 %258 }
 0x4e5   :  { %v265_v3 = vsel %vm263_vm3, %v259_v2, 0 }
 0x4e6   :  { %1666 = vmatpush3.bf16.msra.mxu1 %v265_v3 }
 0x4e7   :  { %1671 = vmatprep.subr.bf16.mxu1 %v2008_v15 }
 0x4e8   :  { %v425_v9 = vpop.permute.xlu1 %424 }
 0x4e9   :  { %v430_v10 = vsel %vm198_vm2, %v425_v9, 0 }
 0x4eb   :  { %v1847_v4 = vpop.eup %1846 }
 0x4ec   :  { %v256_v5 = vmul.f32 %v1847_v4, %v1845_v61  ;;  %v538_v11 = vpop.permute.xlu1 %537 }
 0x4ed   :  { %v543_v13 = vsel %vm198_vm2, %v538_v11, 0 }
 0x4ee   :  { %v257_v7 = vpack.c.bf16 %v256_v5, %v256_v5 }
 0x4f0   :  { %1668 = vmatmul.mubr.msk.bf16.vlgmr.msra.gmra.mrb[8].mxu1 %vm198_vm2, %v257_v7 }
 0x4f1   :  { %1672 = vmatpush3.bf16.xpose.msra.mxu1 %v316_v8  ;;  %1673 = vmatprep.mubr.msk.bf16.mxu1 %vm2009_vm1, %v2008_v15 }
 0x4f2   :  { %1683 = vmatprep.subr.bf16.mxu1 %v2008_v15 }
 0x4f8   :  { %1674 = vmatmul.mubr.msk.bf16.vlgmr.msra.gmra.mrb[12].mxu1 %vm198_vm2, %v2170_v48 }
 0x4f9   :  { %1684 = vmatpush3.bf16.xpose.msra.mxu1 %v430_v10  ;;  %1685 = vmatprep.mubr.msk.bf16.mxu1 %vm2009_vm1, %v2008_v15 }
 0x4fa   :  { %1695 = vmatprep.subr.bf16.mxu1 %v2008_v15 }
 0x500   :  { %1686 = vmatmul.mubr.msk.bf16.vlgmr.msra.gmra.mrb[16].mxu1 %vm198_vm2, %v423_v12 }
 0x501   :  { %1696 = vmatpush3.bf16.xpose.msra.mxu1 %v543_v13  ;;  %1697 = vmatprep.mubr.msk.bf16.mxu1 %vm2009_vm1, %v2008_v15 }
 0x502   :  { %1707 = vmatprep.subr.bf16.mxu1 %v2008_v15 }
 0x508   :  { %1698 = vmatmul.mubr.msk.bf16.vlgmr.msra.gmra.mrb[20].mxu1 %vm198_vm2, %v536_v14 }
 0x509   :  { %1709 = vmatprep.mubr.msk.bf16.mxu1 %vm2009_vm1, %v2008_v15 }
 0x5c3   :  { %v2211_v16 = vpop.f32.mrb[8].mxu1 }
 0x5c4   :  { %v1669_v17 = vpop.f32.mrb[9].mxu1 }
 0x5c5   :  { %v304_v18 = vpop.f32.mrb[10].mxu1 }
 0x5c6   :  { %v1670_v19 = vpop.f32.mrb[11].mxu1  ;;  %v190_v18 = vld [vmem:[#allocation5] sm:$0xf] }
 0x5c7   :  { %v698_v19 = vsel %vm263_vm3, %v190_v18, 0 }
 0x5cb   :  { %v352_v21 = vpop.f32.mrb[12].mxu1 }
 0x5cc   :  { %v358_v22 = vadd.f32 %v1560_v20, %v352_v21  ;;  %v1675_v23 = vpop.f32.mrb[13].mxu1  ;;  %v191_v20 = vld [vmem:[#allocation5 + $0x4] sm:$0xf] }
 0x5cd   :  { %v355_v25 = vpop.f32.mrb[14].mxu1  ;;  %v651_v21 = vsel %vm263_vm3, %v191_v20, 0 }
 0x5ce   :  { %v1676_v27 = vpop.f32.mrb[15].mxu1  ;;  %v359_v28 = vsel %vm198_vm2, %v358_v22, -inf  ;;  %1708 = vmatpush3.bf16.msra.mxu1 %v651_v21 }
 0x5cf   :  { %360 = vmax.xlane.f32.xlu1 %v359_v28  ;;  %1719 = vmatprep.subr.bf16.mxu1 %v2008_v15 }
 0x5d3   :  { %v466_v30 = vpop.f32.mrb[16].mxu1 }
 0x5d4   :  { %v472_v31 = vadd.f32 %v1563_v29, %v466_v30  ;;  %v1687_v32 = vpop.f32.mrb[17].mxu1 }
 0x5d5   :  { %v469_v33 = vpop.f32.mrb[18].mxu1 }
 0x5d6   :  { %v1688_v34 = vpop.f32.mrb[19].mxu1  ;;  %v473_v35 = vsel %vm198_vm2, %v472_v31, -inf }
 0x5d7   :  { %474 = vmax.xlane.f32.xlu0 %v473_v35 }
 0x5db   :  { %v579_v37 = vpop.f32.mrb[20].mxu1 }
 0x5dc   :  { %v585_v38 = vadd.f32 %v1566_v36, %v579_v37  ;;  %v1699_v39 = vpop.f32.mrb[21].mxu1 }
 0x5dd   :  { %v582_v40 = vpop.f32.mrb[22].mxu1 }
 0x5de   :  { %v1700_v41 = vpop.f32.mrb[23].mxu1  ;;  %v586_v42 = vsel %vm198_vm2, %v585_v38, -inf }
 0x5df   :  { %587 = vmax.xlane.f32.xlu0 %v586_v42 }
 0x5e0   :  { %371 = vrot.lane.b32.xlu1 %v2170_v48, %s2004_s13  ;;  %s2013_s13 = smov 56  }
 0x65c   :  { %v361_v43 = vpop.xlane.xlu1 %360 }
 0x65d   :  { %v362_v44 = vsub.f32 %v358_v22, %v361_v43 }
 0x65f   :  { %v363_v45 = vmul.f32 1.442695, %v362_v44 }
 0x660   :  { %v372_v46 = vpop.permute.xlu1 %371 }
 0x661   :  { %1848 = vpow2.f32 %v363_v45  ;;  %v377_v49 = vsel %vm263_vm3, %v372_v46, 0 }
 0x662   :  { %1678 = vmatpush3.bf16.msra.mxu0 %v377_v49 }
 0x663   :  { %1689 = vmatprep.subr.bf16.mxu0 %v2008_v15 }
 0x664   :  { %v475_v50 = vpop.xlane.xlu0 %474 }
 0x665   :  { %v476_v51 = vsub.f32 %v472_v31, %v475_v50 }
 0x667   :  { %v477_v52 = vmul.f32 1.442695, %v476_v51 }
 0x669   :  { %1850 = vpow2.f32 %v477_v52 }
 0x66b   :  { %v1849_v53 = vpop.eup %1848 }
 0x66c   :  { %v588_v54 = vpop.xlane.xlu0 %587  ;;  %v365_v55 = vsel %vm198_vm2, %v1849_v53, 0.0 }
 0x66d   :  { %v589_v56 = vsub.f32 %v585_v38, %v588_v54  ;;  %366 = vadd.xlane.f32.xlu0 %v365_v55  ;;  %v1571_v55 = vld [vmem:[%s2420_s1 + $0x10] sm:$0xff] }
 0x66f   :  { %v590_v57 = vmul.f32 1.442695, %v589_v56 }
 0x671   :  { %1852 = vpow2.f32 %v590_v57 }
 0x673   :  { %v1851_v58 = vpop.eup %1850 }
 0x674   :  { %v479_v59 = vsel %vm198_vm2, %v1851_v58, 0.0 }
 0x675   :  { %480 = vadd.xlane.f32.xlu1 %v479_v59 }
 0x67b   :  { %v1853_v60 = vpop.eup %1852 }
 0x67c   :  { %v592_v61 = vsel %vm198_vm2, %v1853_v60, 0.0 }
 0x67d   :  { %593 = vadd.xlane.f32.xlu0 %v592_v61 }
 0x686   :  { %598 = vrot.lane.b32.xlu1 %v2170_v48, %s2013_s13 }
 0x68a   :  { %745 = vrot.lane.b32.xlu1 %v2166_v47, %s2014_s27 }
 0x68e   :  { %743 = vrot.lane.b32.xlu1 %v2166_v47, %s2015_s17 }
 0x692   :  { %856 = vrot.lane.b32.xlu1 %v2170_v48, %s2015_s17 }
 0x693   :  { %485 = vrot.lane.b32.xlu0 %v2166_v47, %s2013_s13 }
 0x697   :  { %858 = vrot.lane.b32.xlu0 %v2170_v48, %s2014_s27 }
 0x6fa   :  { %v367_v62 = vpop.xlane.xlu0 %366 }
 0x6fb   :  { %1854 = vrcp.f32 %v367_v62  ;;  %v1574_v62 = vld [vmem:[%s2420_s1 + $0x30] sm:$0xff] }
 0x702   :  { %v481_v63 = vpop.xlane.xlu1 %480 }
 0x703   :  { %1856 = vrcp.f32 %v481_v63 }
 0x705   :  { %v1855_v2 = vpop.eup %1854 }
 0x706   :  { %v369_v3 = vmul.f32 %v1855_v2, %v1849_v53  ;;  %v599_v10 = vpop.permute.xlu1 %598 }
 0x707   :  { %v604_v12 = vsel %vm263_vm3, %v599_v10, 0 }
 0x708   :  { %v370_v4 = vpack.c.bf16 %v369_v3, %v369_v3 }
 0x70a   :  { %1680 = vmatmul.mubr.msk.bf16.vlgmr.msra.gmra.mrb[0].mxu0 %vm198_vm2, %v370_v4  ;;  %v594_v5 = vpop.xlane.xlu0 %593  ;;  %v746_v33 = vpop.permute.xlu1 %745 }
 0x70b   :  { %1858 = vrcp.f32 %v594_v5  ;;  %1691 = vmatprep.mubr.msk.bf16.mxu0 %vm2009_vm1, %v2008_v15  ;;  %v751_v38 = vsel %vm198_vm2, %v746_v33, 0 }
 0x70d   :  { %v1857_v6 = vpop.eup %1856 }
 0x70e   :  { %v483_v7 = vmul.f32 %v1857_v6, %v1851_v58  ;;  %v486_v8 = vpop.permute.xlu0 %485  ;;  %v744_v40 = vpop.permute.xlu1 %743 }
 0x70f   :  { %v491_v9 = vsel %vm263_vm3, %v486_v8, 0 }
 0x710   :  { %1690 = vmatpush3.bf16.msra.mxu0 %v491_v9  ;;  %v484_v11 = vpack.c.bf16 %v483_v7, %v483_v7 }
 0x711   :  { %1701 = vmatprep.subr.bf16.mxu0 %v2008_v15 }
 0x712   :  { %v859_v39 = vpop.permute.xlu0 %858  ;;  %v857_v42 = vpop.permute.xlu1 %856 }
 0x713   :  { %1692 = vmatmul.mubr.msk.bf16.vlgmr.msra.gmra.mrb[4].mxu0 %vm198_vm2, %v484_v11  ;;  %v864_v41 = vsel %vm198_vm2, %v859_v39, 0 }
 0x714   :  { %1702 = vmatpush3.bf16.msra.mxu0 %v604_v12  ;;  %1703 = vmatprep.mubr.msk.bf16.mxu0 %vm2009_vm1, %v2008_v15 }
 0x715   :  { %v1859_v13 = vpop.eup %1858  ;;  %1713 = vmatprep.subr.bf16.mxu0 %v2008_v15 }
 0x716   :  { %v596_v14 = vmul.f32 %v1859_v13, %v1853_v60 }
 0x718   :  { %v597_v17 = vpack.c.bf16 %v596_v14, %v596_v14 }
 0x71b   :  { %1704 = vmatmul.mubr.msk.bf16.vlgmr.msra.gmra.mrb[8].mxu0 %vm198_vm2, %v597_v17 }
 0x71c   :  { %1715 = vmatprep.mubr.msk.bf16.mxu0 %vm2009_vm1, %v2008_v15  ;;  %1714 = vmatpush3.bf16.msra.mxu0 %v698_v19 }
 0x71d   :  { %1725 = vmatprep.subr.bf16.mxu0 %v2008_v15 }
 0x7dd   :  { %v413_v22 = vpop.f32.mrb[0].mxu0 }
 0x7de   :  { %v419_v23 = vpack.c.bf16 %v413_v22, %v2211_v16  ;;  %v1681_v25 = vpop.f32.mrb[1].mxu0 }
 0x7df   :  { %v416_v27 = vpop.f32.mrb[2].mxu0 }
 0x7e0   :  { %v1682_v28 = vpop.f32.mrb[3].mxu0  ;;  %1716 = vmatmul.mubr.msk.bf16.vlgmr.msra.gmra.mrb[12].mxu0 %vm198_vm2, %v419_v23 }
 0x7e1   :  { %1727 = vmatprep.mubr.msk.bf16.mxu0 %vm2009_vm1, %v2008_v15 }
 0x7e6   :  { %v527_v29 = vpop.f32.mrb[4].mxu0 }
 0x7e7   :  { %v1693_v30 = vpop.f32.mrb[5].mxu0 }
 0x7e8   :  { %v530_v31 = vpop.f32.mrb[6].mxu0 }
 0x7e9   :  { %v1694_v32 = vpop.f32.mrb[7].mxu0 }
 0x7ee   :  { %v640_v34 = vpop.f32.mrb[8].mxu0 }
 0x7ef   :  { %v646_v35 = vpack.c.bf16 %v640_v34, %v527_v29  ;;  %v1705_v36 = vpop.f32.mrb[9].mxu0 }
 0x7f0   :  { %v643_v37 = vpop.f32.mrb[10].mxu0 }
 0x7f1   :  { %v1706_v16 = vpop.f32.mrb[11].mxu0  ;;  %1710 = vmatmul.mubr.msk.bf16.vlgmr.msra.gmra.mrb[24].mxu1 %vm198_vm2, %v646_v35 }
 0x7f2   :  { %1720 = vmatpush3.bf16.xpose.msra.mxu1 %v751_v38  ;;  %1721 = vmatprep.mubr.msk.bf16.mxu1 %vm2009_vm1, %v2008_v15  ;;  %v192_v16 = vld [vmem:[#allocation5 + $0x8] sm:$0xf] }
 0x7f3   :  { %1731 = vmatprep.subr.bf16.mxu1 %v2008_v15  ;;  %v972_v39 = vsel %vm263_vm3, %v192_v16, 0 }
 0x7f9   :  { %1722 = vmatmul.mubr.msk.bf16.vlgmr.msra.gmra.mrb[28].mxu1 %vm198_vm2, %v744_v40 }
 0x7fa   :  { %1732 = vmatpush3.bf16.xpose.msra.mxu1 %v864_v41  ;;  %1733 = vmatprep.mubr.msk.bf16.mxu1 %vm2009_vm1, %v2008_v15 }
 0x7fb   :  { %1743 = vmatprep.subr.bf16.mxu1 %v2008_v15 }
 0x801   :  { %1734 = vmatmul.mubr.msk.bf16.vlgmr.msra.gmra.mrb[32].mxu1 %vm198_vm2, %v857_v42 }
 0x802   :  { %1745 = vmatprep.mubr.msk.bf16.mxu1 %vm2009_vm1, %v2008_v15  ;;  %1744 = vmatpush3.bf16.msra.mxu1 %v972_v39 }
 0x803   :  { %1755 = vmatprep.subr.bf16.mxu1 %v2008_v15 }
 0x8b3   :  { %v734_v43 = vpop.f32.mrb[12].mxu0 }
 0x8b4   :  { %v1717_v44 = vpop.f32.mrb[13].mxu0 }
 0x8b5   :  { %v737_v45 = vpop.f32.mrb[14].mxu0 }
 0x8b6   :  { %v1718_v46 = vpop.f32.mrb[15].mxu0 }
 0x8c4   :  { %v687_v49 = vpop.f32.mrb[24].mxu1 }
 0x8c5   :  { %v2272_v50 = vadd.f32 %v734_v43, %v687_v49  ;;  %v1711_v51 = vpop.f32.mrb[25].mxu1 }
 0x8c6   :  { %v690_v52 = vpop.f32.mrb[26].mxu1 }
 0x8c7   :  { %v2274_v53 = vadd.f32 %v737_v45, %v690_v52  ;;  %v1712_v54 = vpop.f32.mrb[27].mxu1  ;;  %v1578_v52 = vld [vmem:[%s2420_s1 + $0x18] sm:$0xff] }
 0x8cc   :  { %v787_v56 = vpop.f32.mrb[28].mxu1 }
 0x8cd   :  { %v793_v57 = vadd.f32 %v1571_v55, %v787_v56  ;;  %v1723_v58 = vpop.f32.mrb[29].mxu1 }
 0x8ce   :  { %v790_v59 = vpop.f32.mrb[30].mxu1 }
 0x8cf   :  { %v1724_v60 = vpop.f32.mrb[31].mxu1  ;;  %v794_v61 = vsel %vm198_vm2, %v793_v57, -inf }
 0x8d0   :  { %795 = vmax.xlane.f32.xlu0 %v794_v61  ;;  %v1581_v60 = vld [vmem:[%s2420_s1 + $0x38] sm:$0xff] }
 0x8d4   :  { %v900_v63 = vpop.f32.mrb[32].mxu1 }
 0x8d5   :  { %v906_v2 = vadd.f32 %v1574_v62, %v900_v63  ;;  %v1735_v3 = vpop.f32.mrb[33].mxu1 }
 0x8d6   :  { %v903_v4 = vpop.f32.mrb[34].mxu1 }
 0x8d7   :  { %v1736_v5 = vpop.f32.mrb[35].mxu1  ;;  %v907_v6 = vsel %vm198_vm2, %v906_v2, -inf }
 0x8d8   :  { %908 = vmax.xlane.f32.xlu1 %v907_v6 }
 0x8e9   :  { %919 = vrot.lane.b32.xlu1 %v2170_v48, %s2016_s22 }
 0x8ed   :  { %1021 = vrot.lane.b32.xlu1 %v2166_v47, %s2017_s23 }
 0x8f1   :  { %1019 = vrot.lane.b32.xlu1 %v2166_v47, %s2018_s24 }
 0x8f5   :  { %1132 = vrot.lane.b32.xlu1 %v2170_v48, %s2018_s24 }
 0x95d   :  { %v796_v7 = vpop.xlane.xlu0 %795 }
 0x95e   :  { %v797_v8 = vsub.f32 %v793_v57, %v796_v7 }
 0x960   :  { %v798_v9 = vmul.f32 1.442695, %v797_v8 }
 0x962   :  { %1860 = vpow2.f32 %v798_v9 }
 0x965   :  { %v909_v10 = vpop.xlane.xlu1 %908 }
 0x966   :  { %v910_v11 = vsub.f32 %v906_v2, %v909_v10 }
 0x968   :  { %v911_v12 = vmul.f32 1.442695, %v910_v11 }
 0x969   :  { %v920_v27 = vpop.permute.xlu1 %919 }
 0x96a   :  { %1862 = vpow2.f32 %v911_v12  ;;  %v925_v29 = vsel %vm263_vm3, %v920_v27, 0 }
 0x96c   :  { %v1861_v13 = vpop.eup %1860 }
 0x96d   :  { %v800_v14 = vsel %vm198_vm2, %v1861_v13, 0.0  ;;  %v1022_v33 = vpop.permute.xlu1 %1021 }
 0x96e   :  { %801 = vadd.xlane.f32.xlu0 %v800_v14  ;;  %v1027_v34 = vsel %vm198_vm2, %v1022_v33, 0  ;;  %v193_v33 = vld [vmem:[#allocation5 + $0xc] sm:$0xf] }
 0x971   :  { %v1020_v36 = vpop.permute.xlu1 %1019 }
 0x974   :  { %v1863_v17 = vpop.eup %1862 }
 0x975   :  { %v913_v18 = vsel %vm198_vm2, %v1863_v17, 0.0  ;;  %v1133_v38 = vpop.permute.xlu1 %1132 }
 0x976   :  { %914 = vadd.xlane.f32.xlu0 %v913_v18 }
 0x98c   :  { %806 = vrot.lane.b32.xlu0 %v2166_v47, %s2016_s22 }
 0x990   :  { %1134 = vrot.lane.b32.xlu0 %v2170_v48, %s2017_s23 }
 0x9fb   :  { %v802_v19 = vpop.xlane.xlu0 %801 }
 0x9fc   :  { %1864 = vrcp.f32 %v802_v19 }
 0xa03   :  { %v915_v20 = vpop.xlane.xlu0 %914 }
 0xa04   :  { %1866 = vrcp.f32 %v915_v20 }
 0xa06   :  { %v1865_v21 = vpop.eup %1864 }
 0xa07   :  { %v804_v22 = vmul.f32 %v1865_v21, %v1861_v13  ;;  %v807_v23 = vpop.permute.xlu0 %806 }
 0xa08   :  { %v812_v25 = vsel %vm263_vm3, %v807_v23, 0 }
 0xa09   :  { %1726 = vmatpush3.bf16.msra.mxu0 %v812_v25  ;;  %v805_v28 = vpack.c.bf16 %v804_v22, %v804_v22 }
 0xa0a   :  { %1737 = vmatprep.subr.bf16.mxu0 %v2008_v15 }
 0xa0b   :  { %v1135_v35 = vpop.permute.xlu0 %1134 }
 0xa0c   :  { %1728 = vmatmul.mubr.msk.bf16.vlgmr.msra.gmra.mrb[16].mxu0 %vm198_vm2, %v805_v28  ;;  %v1140_v37 = vsel %vm198_vm2, %v1135_v35, 0 }
 0xa0d   :  { %1738 = vmatpush3.bf16.msra.mxu0 %v925_v29  ;;  %1739 = vmatprep.mubr.msk.bf16.mxu0 %vm2009_vm1, %v2008_v15 }
 0xa0e   :  { %v1867_v30 = vpop.eup %1866  ;;  %1749 = vmatprep.subr.bf16.mxu0 %v2008_v15 }
 0xa0f   :  { %v917_v31 = vmul.f32 %v1867_v30, %v1863_v17 }
 0xa11   :  { %v918_v32 = vpack.c.bf16 %v917_v31, %v917_v31 }
 0xa14   :  { %1740 = vmatmul.mubr.msk.bf16.vlgmr.msra.gmra.mrb[20].mxu0 %vm198_vm2, %v918_v32 }
 0xa15   :  { %1751 = vmatprep.mubr.msk.bf16.mxu0 %vm2009_vm1, %v2008_v15 }
 0xa16   :  { %1750 = vmatpush3.bf16.xpose.msra.mxu0 %v1027_v34  ;;  %v1248_v34 = vsel %vm263_vm3, %v193_v33, 0  ;;  %v1837_v33 = vld [vmem:[%s2424_s5 + $0x28] sm:$0xff]  }
 0xa17   :  { %1761 = vmatprep.subr.bf16.mxu0 %v2008_v15 }
 0xa1d   :  { %1752 = vmatmul.mubr.msk.bf16.vlgmr.msra.gmra.mrb[24].mxu0 %vm198_vm2, %v1020_v36 }
 0xa1e   :  { %1762 = vmatpush3.bf16.xpose.msra.mxu0 %v1140_v37  ;;  %1763 = vmatprep.mubr.msk.bf16.mxu0 %vm2009_vm1, %v2008_v15 }
 0xa1f   :  { %1773 = vmatprep.subr.bf16.mxu0 %v2008_v15 }
 0xa25   :  { %1764 = vmatmul.mubr.msk.bf16.vlgmr.msra.gmra.mrb[28].mxu0 %vm198_vm2, %v1133_v38 }
 0xa26   :  { %1775 = vmatprep.mubr.msk.bf16.mxu0 %vm2009_vm1, %v2008_v15  ;;  %1774 = vmatpush3.bf16.msra.mxu0 %v1248_v34  ;;  %v1838_v34 = vld [vmem:[%s2424_s5 + $0x30] sm:$0xff]  }
 0xa27   :  { %1787 = vmatprep.subr.bf16.mxu0 %v2008_v15 }
 0xadf   :  { %v848_v40 = vpop.f32.mrb[16].mxu0 }
 0xae0   :  { %v1729_v41 = vpop.f32.mrb[17].mxu0 }
 0xae1   :  { %v851_v42 = vpop.f32.mrb[18].mxu0 }
 0xae2   :  { %v1730_v43 = vpop.f32.mrb[19].mxu0 }
 0xae3   :  { %v1295_v43 = vsub.s32 3, %v2153_v24 }
 0xae7   :  { %v961_v44 = vpop.f32.mrb[20].mxu0 }
 0xae8   :  { %v967_v45 = vpack.c.bf16 %v961_v44, %v848_v40  ;;  %v1741_v46 = vpop.f32.mrb[21].mxu0  ;;  %v1296_v44 = vrot.slane %v2156_v26, %v1295_v43 }
 0xae9   :  { %v964_v49 = vpop.f32.mrb[22].mxu0 }
 0xaea   :  { %v1742_v51 = vpop.f32.mrb[23].mxu0  ;;  %1746 = vmatmul.mubr.msk.bf16.vlgmr.msra.gmra.mrb[36].mxu1 %vm198_vm2, %v967_v45 }
 0xaeb   :  { %1757 = vmatprep.mubr.msk.bf16.mxu1 %vm2009_vm1, %v2008_v15 }
 0xaf0   :  { %v1063_v54 = vpop.f32.mrb[24].mxu0 }
 0xaf1   :  { %v1069_v55 = vadd.f32 %v1578_v52, %v1063_v54  ;;  %v1753_v56 = vpop.f32.mrb[25].mxu0 }
 0xaf2   :  { %v1066_v57 = vpop.f32.mrb[26].mxu0 }
 0xaf3   :  { %v1754_v58 = vpop.f32.mrb[27].mxu0  ;;  %v1070_v59 = vsel %vm198_vm2, %v1069_v55, -inf }
 0xaf4   :  { %1071 = vmax.xlane.f32.xlu0 %v1070_v59 }
 0xaf8   :  { %v1176_v61 = vpop.f32.mrb[28].mxu0 }
 0xaf9   :  { %v1182_v62 = vadd.f32 %v1581_v60, %v1176_v61  ;;  %v1765_v63 = vpop.f32.mrb[29].mxu0 }
 0xafa   :  { %v1179_v2 = vpop.f32.mrb[30].mxu0 }
 0xafb   :  { %v1766_v3 = vpop.f32.mrb[31].mxu0  ;;  %v1183_v4 = vsel %vm198_vm2, %v1182_v62, -inf }
 0xafc   :  { %1184 = vmax.xlane.f32.xlu1 %v1183_v4 }
 0xb0d   :  { %1195 = vrot.lane.b32.xlu1 %v2170_v48, %s2019_s26 }
 0xb81   :  { %v1072_v5 = vpop.xlane.xlu0 %1071 }
 0xb82   :  { %v1073_v6 = vsub.f32 %v1069_v55, %v1072_v5 }
 0xb84   :  { %v1074_v7 = vmul.f32 1.442695, %v1073_v6 }
 0xb86   :  { %1868 = vpow2.f32 %v1074_v7  ;;  %v1830_v7 = vld [vmem:[#allocation7] sm:$0xff]  }
 0xb89   :  { %v1185_v8 = vpop.xlane.xlu1 %1184 }
 0xb8a   :  { %v1186_v9 = vsub.f32 %v1182_v62, %v1185_v8  ;;  %v1831_v8 = vld [vmem:[#allocation7 + $0x8] sm:$0xff]  }
 0xb8c   :  { %v1187_v10 = vmul.f32 1.442695, %v1186_v9  ;;  %v1832_v9 = vld [vmem:[%s2424_s5] sm:$0xff]  }
 0xb8d   :  { %v1196_v30 = vpop.permute.xlu1 %1195 }
 0xb8e   :  { %1870 = vpow2.f32 %v1187_v10 }
 0xb90   :  { %v1869_v11 = vpop.eup %1868 }
 0xb91   :  { %v1076_v12 = vsel %vm198_vm2, %v1869_v11, 0.0 }
 0xb92   :  { %1077 = vadd.xlane.f32.xlu0 %v1076_v12 }
 0xb98   :  { %v1871_v13 = vpop.eup %1870 }
 0xb99   :  { %v1189_v14 = vsel %vm198_vm2, %v1871_v13, 0.0 }
 0xb9a   :  { %1190 = vadd.xlane.f32.xlu0 %v1189_v14 }
 0xbb0   :  { %1082 = vrot.lane.b32.xlu0 %v2166_v47, %s2019_s26 }
 0xbbd   :  { %v1008_v17 = vpop.f32.mrb[36].mxu1 }
 0xbbe   :  { %v1015_v48 = vadd.f32 %v1008_v17, %v2272_v50  ;;  %v1747_v18 = vpop.f32.mrb[37].mxu1  ;;  %v1201_v50 = vsel %vm263_vm3, %v1196_v30, 0 }
 0xbbf   :  { %v1011_v19 = vpop.f32.mrb[38].mxu1 }
 0xbc0   :  { %v1016_v20 = vadd.f32 %v1011_v19, %v2274_v53  ;;  %v1748_v21 = vpop.f32.mrb[39].mxu1  ;;  %v1335_v19 = vsub.s32 5, %v2153_v24 }
 0xc1f   :  { %v1078_v22 = vpop.xlane.xlu0 %1077 }
 0xc20   :  { %1872 = vrcp.f32 %v1078_v22 }
 0xc27   :  { %v1191_v23 = vpop.xlane.xlu0 %1190 }
 0xc28   :  { %1874 = vrcp.f32 %v1191_v23 }
 0xc2a   :  { %v1873_v25 = vpop.eup %1872 }
 0xc2b   :  { %v1080_v27 = vmul.f32 %v1873_v25, %v1869_v11  ;;  %v1083_v28 = vpop.permute.xlu0 %1082 }
 0xc2c   :  { %v1088_v29 = vsel %vm263_vm3, %v1083_v28, 0 }
 0xc2d   :  { %1756 = vmatpush3.bf16.msra.mxu1 %v1088_v29  ;;  %v1081_v47 = vpack.c.bf16 %v1080_v27, %v1080_v27  ;;  %v1336_v27 = vrot.slane %v2156_v26, %v1335_v19 }
 0xc2e   :  { %1767 = vmatprep.subr.bf16.mxu1 %v2008_v15 }
 0xc30   :  { %1758 = vmatmul.mubr.msk.bf16.vlgmr.msra.gmra.mrb[40].mxu1 %vm198_vm2, %v1081_v47 }
 0xc31   :  { %1768 = vmatpush3.bf16.msra.mxu1 %v1201_v50  ;;  %1769 = vmatprep.mubr.msk.bf16.mxu1 %vm2009_vm1, %v2008_v15  ;;  %v1833_v50 = vld [vmem:[%s2424_s5 + $0x8] sm:$0xff]  }
 0xc32   :  { %v1875_v53 = vpop.eup %1874  ;;  %1779 = vmatprep.subr.bf16.mxu1 %v2008_v15 }
 0xc33   :  { %v1193_v31 = vmul.f32 %v1875_v53, %v1871_v13  ;;  %v1834_v53 = vld [vmem:[%s2424_s5 + $0x10] sm:$0xff]  }
 0xc35   :  { %v1194_v32 = vpack.c.bf16 %v1193_v31, %v1193_v31  ;;  %v1835_v31 = vld [vmem:[%s2424_s5 + $0x18] sm:$0xff]  }
 0xc38   :  { %1770 = vmatmul.mubr.msk.bf16.vlgmr.msra.gmra.mrb[44].mxu1 %vm198_vm2, %v1194_v32  ;;  %v1836_v32 = vld [vmem:[%s2424_s5 + $0x20] sm:$0xff]  }
 0xc39   :  { %1783 = vmatprep.mubr.msk.bf16.mxu1 %vm2009_vm1, %v2008_v15  ;;  %1780 = vmatpush3.bf16.msra.mxu1 %v1830_v7 }
 0xc3a   :  { %1781 = vmatprep.subr.bf16.mxu1 %v2008_v15 }
 0xc3d   :  { %1782 = vmatpush3.bf16.msra.mxu1 %v1831_v8 }
 0xd03   :  { %v1124_v35 = vpop.f32.mrb[40].mxu1 }
 0xd04   :  { %v1759_v36 = vpop.f32.mrb[41].mxu1 }
 0xd05   :  { %v1127_v37 = vpop.f32.mrb[42].mxu1  ;;  %v1346_v36 = vsub.s32 6, %v2153_v24 }
 0xd06   :  { %v1760_v38 = vpop.f32.mrb[43].mxu1 }
 0xd07   :  { %v1347_v37 = vrot.slane %v2156_v26, %v1346_v36 }
 0xd0b   :  { %v1237_v16 = vpop.f32.mrb[44].mxu1 }
 0xd0c   :  { %v1243_v39 = vpack.c.bf16 %v1237_v16, %v1124_v35  ;;  %v1771_v40 = vpop.f32.mrb[45].mxu1  ;;  %v1839_v35 = vld [vmem:[%s2424_s5 + $0x38] sm:$0xff]   ;;  %s2020_s5 = smov [#allocation10]  }
 0xd0d   :  { %v1240_v41 = vpop.f32.mrb[46].mxu1  ;;  %s1541_s17 = sshll.u32 %s2020_s5, 4  ;;  %s1542_s17 = int_to_ptr.vmem [resolvable:$true] %s1541_s17 }
 0xd0e   :  { %v1772_v42 = vpop.f32.mrb[47].mxu1  ;;  %1776 = vmatmul.mubr.msk.bf16.vlgmr.msra.gmra.mrb[32].mxu0 %vm198_vm2, %v1243_v39  ;;  %s1972_s18 = scalar_lea.vmem %s1542_s17, 256  ;;  %p1977_p5 = scmp.lt.s32.totalorder %s1542_s17, %s1542_s17 }
 0xd0f   :  { %1803 = vmatprep.mubr.msk.bf16.mxu0 %vm2009_vm1, %v2008_v15  ;;  %1788 = vmatpush3.bf16.msra.mxu0 %v1832_v9  ;;  %p1973_p4 = scmp.ne.s32.totalorder %s1542_s17, %s1972_s18  ;;  %p1978_p6 = scmp.lt.s32.totalorder %s1972_s18, %s1972_s18 }
 0xd10   :  { %1789 = vmatprep.subr.bf16.mxu0 %v2008_v15 }
 0xd11   :  { %p1979_p7 = por %p1978_p6, %p1977_p5 }
 0xd13   :  { %1790 = vmatpush3.bf16.msra.mxu0 %v1833_v50  ;;  %p1980_p8 = pnand %p1979_p7, %p1973_p4 }
 0xd14   :  { %1791 = vmatprep.subr.bf16.mxu0 %v2008_v15 }
 0xd17   :  { %1792 = vmatpush3.bf16.msra.mxu0 %v1834_v53 }
 0xd18   :  { %1793 = vmatprep.subr.bf16.mxu0 %v2008_v15 }
 0xd1b   :  { %1794 = vmatpush3.bf16.msra.mxu0 %v1835_v31 }
 0xd1c   :  { %1795 = vmatprep.subr.bf16.mxu0 %v2008_v15 }
 0xd1f   :  { %1796 = vmatpush3.bf16.msra.mxu0 %v1836_v32 }
 0xd20   :  { %1797 = vmatprep.subr.bf16.mxu0 %v2008_v15 }
 0xd23   :  { %1798 = vmatpush3.bf16.msra.mxu0 %v1837_v33 }
 0xd24   :  { %1799 = vmatprep.subr.bf16.mxu0 %v2008_v15 }
 0xd27   :  { %1800 = vmatpush3.bf16.msra.mxu0 %v1838_v34 }
 0xd28   :  { %1801 = vmatprep.subr.bf16.mxu0 %v2008_v15 }
 0xd2b   :  { %1802 = vmatpush3.bf16.msra.mxu0 %v1839_v35 }
 0xde1   :  { %v1284_v45 = vpop.f32.mrb[32].mxu0 }
 0xde2   :  { %v1291_v46 = vadd.f32 %v1284_v45, %v1015_v48  ;;  %v1777_v49 = vpop.f32.mrb[33].mxu0  ;;  %v1329_v48 = vsub.s32 4, %v2153_v24 }
 0xde3   :  { %v1287_v51 = vpop.f32.mrb[34].mxu0 }
 0xde4   :  { %v1297_v52 = vadd.f32 %v1296_v44, %v1291_v46  ;;  %v1292_v54 = vadd.f32 %v1287_v51, %v1016_v20  ;;  %v1778_v55 = vpop.f32.mrb[35].mxu0  ;;  %v1330_v18 = vrot.slane %v2156_v26, %v1329_v48 }
 0xde6   :  { %v2349_v56 = vadd.f32 %v1297_v52, %v2130_v0  ;;  %v1298_v57 = vadd.f32 %v1296_v44, %v1292_v54 }
 0xde8   :  { %v2352_v58 = vadd.f32 %v1298_v57, %v2135_v1  ;;  %v1301_v59 = vsel %vm84_vm0, %v2349_v56, 0.0 }
 0xde9   :  { %1302 = vadd.xlane.f32.xlu1 %v1301_v59 }
 0xdea   :  { %v1304_v60 = vsel %vm84_vm0, %v2352_v58, 0.0 }
 0xdeb   :  { %1305 = vadd.xlane.f32.xlu0 %v1304_v60 }
 0xe76   :  { %v1303_v61 = vpop.xlane.xlu1 %1302 }
 0xe77   :  { %v1307_v62 = vmul.f32 0.03125, %v1303_v61 }
 0xe78   :  { %v1306_v63 = vpop.xlane.xlu0 %1305 }
 0xe79   :  { %v1309_v2 = vsub.f32 %v2349_v56, %v1307_v62  ;;  %v1308_v3 = vmul.f32 0.03125, %v1306_v63 }
 0xe7b   :  { %v1310_v0 = vsub.f32 %v2352_v58, %v1308_v3  ;;  %v1311_v4 = vmul.f32 %v1309_v2, %v1309_v2 }
 0xe7d   :  { %v1313_v1 = vsel %vm84_vm0, %v1311_v4, 0.0  ;;  %v1312_v5 = vmul.f32 %v1310_v0, %v1310_v0  ;;  %v1441_v4 = vsub.s32 7, %v2153_v24 }
 0xe7e   :  { %1314 = vadd.xlane.f32.xlu0 %v1313_v1 }
 0xe7f   :  { %v1316_v6 = vsel %vm84_vm0, %v1312_v5, 0.0  ;;  %v1442_v1 = vrot.slane %v2156_v26, %v1441_v4 }
 0xe80   :  { %1317 = vadd.xlane.f32.xlu1 %v1316_v6 }
 0xf0b   :  { %v1315_v10 = vpop.xlane.xlu0 %1314 }
 0xf0c   :  { %v1319_v11 = vmul.f32 0.03125, %v1315_v10 }
 0xf0d   :  { %v1318_v12 = vpop.xlane.xlu1 %1317 }
 0xf0e   :  { %v1321_v13 = vadd.f32 1e-05, %v1319_v11  ;;  %v1320_v14 = vmul.f32 0.03125, %v1318_v12 }
 0xf10   :  { %1876 = vrsqrt.f32 %v1321_v13  ;;  %v1322_v17 = vadd.f32 1e-05, %v1320_v14 }
 0xf12   :  { %1878 = vrsqrt.f32 %v1322_v17 }
 0xf1a   :  { %v1877_v20 = vpop.eup %1876 }
 0xf1b   :  { %v1325_v21 = vmul.f32 %v1877_v20, %v1309_v2 }
 0xf1c   :  { %v1879_v22 = vpop.eup %1878 }
 0xf1d   :  { %v1331_v23 = vmul.f32 %v1330_v18, %v1325_v21  ;;  %v1326_v25 = vmul.f32 %v1879_v22, %v1310_v0 }
 0xf1f   :  { %v1332_v28 = vmul.f32 %v1330_v18, %v1326_v25  ;;  %v1337_v29 = vadd.f32 %v1336_v27, %v1331_v23 }
 0xf21   :  { %v1338_v30 = vadd.f32 %v1336_v27, %v1332_v28 }
 0xf23   :  { %v1339_v47 = vpack.c.bf16 %v1338_v30, %v1337_v29 }
 0xf25   :  { %1784 = vmatmul.mubr.msk.bf16.vlgmr.msra.gmra.mrb[48].mxu1 %vm84_vm0, %v1339_v47 }
 0xff8   :  { %v1397_v38 = vpop.f32.mrb[48].mxu1 }
 0xff9   :  { %v1398_v16 = vadd.f32 %v1397_v38, %v1347_v37  ;;  %v1785_v39 = vpop.f32.mrb[49].mxu1 }
 0xffa   :  { %v1400_v40 = vpop.f32.mrb[50].mxu1 }
 0xffb   :  { %v1408_v41 = vmul.f32 0.044715, %v1398_v16  ;;  %v1401_v42 = vadd.f32 %v1400_v40, %v1347_v37  ;;  %v1786_v43 = vpop.f32.mrb[51].mxu1  ;;  %v1406_v46 = vmul.f32 0.7978846, %v1398_v16  ;;  %v1404_v61 = vmul.f32 0.5, %v1398_v16 }
 0xffd   :  { %v1410_v44 = vmul.f32 %v1408_v41, %v1398_v16  ;;  %v1409_v45 = vmul.f32 0.044715, %v1401_v42  ;;  %v1407_v54 = vmul.f32 0.7978846, %v1401_v42  ;;  %v1405_v62 = vmul.f32 0.5, %v1401_v42 }
 0xfff   :  { %v1412_v49 = vadd.f32 1.0, %v1410_v44  ;;  %v1411_v51 = vmul.f32 %v1409_v45, %v1401_v42 }
0x1001   :  { %v1414_v52 = vmul.f32 %v1412_v49, %v1406_v46  ;;  %v1413_v15 = vadd.f32 1.0, %v1411_v51 }
0x1003   :  { %1880 = vtanh.f32 %v1414_v52  ;;  %v1415_v55 = vmul.f32 %v1413_v15, %v1407_v54 }
0x1005   :  { %1882 = vtanh.f32 %v1415_v55 }
0x100d   :  { %v1881_v57 = vpop.eup %1880 }
0x100e   :  { %v1418_v59 = vadd.f32 1.0, %v1881_v57 }
0x100f   :  { %v1883_v60 = vpop.eup %1882 }
0x1010   :  { %v1419_v63 = vadd.f32 1.0, %v1883_v60  ;;  %v1420_v2 = vmul.f32 %v1418_v59, %v1404_v61 }
0x1012   :  { %v1421_v3 = vmul.f32 %v1419_v63, %v1405_v62 }
0x1014   :  { %v1422_v0 = vpack.c.bf16 %v1421_v3, %v1420_v2 }
0x1016   :  { %1804 = vmatmul.mubr.bf16.vlgmr.msra.gmra.mrb[36].mxu0 %v1422_v0 }
0x10e9   :  { %v1525_v5 = vpop.f32.mrb[36].mxu0 }
0x10ea   :  { %v1526_v6 = vadd.f32 %v1525_v5, %v1442_v1  ;;  %v1805_v7 = vpop.f32.mrb[37].mxu0 }
0x10eb   :  { %v1528_v8 = vpop.f32.mrb[38].mxu0 }
0x10ec   :  { %v1532_v9 = vadd.f32 %v1526_v6, %v2349_v56  ;;  %v1529_v10 = vadd.f32 %v1528_v8, %v1442_v1  ;;  %v1806_v11 = vpop.f32.mrb[39].mxu0 }
0x10ee   :  { %1534 = vst.msk [vmem:[#allocation10] sm:$0xff] %vm84_vm0, %v1532_v9  ;;  %v1533_v12 = vadd.f32 %v1529_v10, %v2352_v58 }
0x10f0   :  { %1535 = vst.msk [vmem:[#allocation10 + $0x8] sm:$0xff] %vm84_vm0, %v1533_v12 }
0x10f1   :  { %1983 = shalt.err (!%p1980_p8)
}
0x10f2   :  { %s1984_s21 = scalar_lea.hbm %s2426_s7, 256 }
0x10f3   :  { %p1985_p9 = scmp.ne.s32.totalorder %s2426_s7, %s1984_s21  ;;  %p1988_p10 = scmp.lt.u32.totalorder %s1984_s21, %s2426_s7 }
0x10f5   :  { %p1990_p11 = pnand %p1988_p10, %p1985_p9 }
0x10f7   :  { %1993 = shalt.err (!%p1990_p11)
}
0x10f8   :  { %s2021_s4 = smov 128   ;;  %s2022_s14 = smov 8  }
0x10f9   :  { %1547 = dma.vmem_to_hbm [thread:$0]  %s1542_s17, 256, %s2426_s7, [#allocation4], %s2021_s4, %s2021_s4, %s2022_s14  }
0x10fa   :  { %2000 = dma.done.wait [#allocation4], 256  }
0x10fb   :  { %2001 = vsyncadd [#allocation4], 4294967040 }
0x10fc   :  { %1551 = vsyncpa [#allocation3], 1 }
0x10fd   :  { %1552 = vsyncpa [#allocation6], 1 }
0x10fe   :  { %1553 = vsyncpa [#allocation9], 1 }
0x10ff   :  { %1554 = vsyncpa [#allocation4], 1 }

</bundles_post_ra>
